<compile_context>
chip_gen: v7x
topology: tpu7x:2x2x1
jax: 0.10.0
libtpu: 0.0.40
codegen_flags: <defaults>
</compile_context>

<pallas_src>
import functools
import math

import jax
import jax.numpy as jnp
from jax.experimental import pallas as pl
from jax.experimental.pallas import tpu as pltpu


# ---------------------------------------------------------------------------
# Kernel 1: fused input-side projection, row-tiled over flattened (T*B) rows.
#   pre[row] = x[row] @ Wx + sum_k feat_k[row] @ Wf_k + b_comb
# ---------------------------------------------------------------------------
def _make_proj_kernel(n_feats):
    def proj_kernel(*refs):
        x_ref = refs[0]
        feat_refs = refs[1:1 + n_feats]
        wx_ref = refs[1 + n_feats]
        wf_refs = refs[2 + n_feats:2 + 2 * n_feats]
        b_ref = refs[2 + 2 * n_feats]
        out_ref = refs[-1]
        acc = jnp.dot(x_ref[...], wx_ref[...],
                      preferred_element_type=jnp.float32)
        for f_ref, w_ref in zip(feat_refs, wf_refs):
            acc = acc + jnp.dot(f_ref[...], w_ref[...],
                                preferred_element_type=jnp.float32)
        out_ref[...] = acc + b_ref[...]
    return proj_kernel


# ---------------------------------------------------------------------------
# Kernel 2: sequential GRU recurrence.  grid = (batch_tiles, T); hidden state
# is carried across the (arbitrary) time axis in a VMEM scratch.
# ---------------------------------------------------------------------------
def _gru_recurrence_kernel(pre_ref, h0_ref, whh_ref, bhn_ref,
                           out_ref, hlast_ref, h_state):
    H = h0_ref.shape[-1]
    t = pl.program_id(1)

    @pl.when(t == 0)
    def _():
        h_state[...] = h0_ref[...].astype(jnp.float32)

    hx = h_state[...]                                            # (tb, H) f32
    gh = jnp.dot(hx.astype(whh_ref.dtype), whh_ref[...],
                 preferred_element_type=jnp.float32)             # (tb, 3H) f32
    g = pre_ref[0]                                               # (tb, 3H) f32
    r = jax.nn.sigmoid(g[:, 0 * H:1 * H] + gh[:, 0 * H:1 * H])   # resetgate
    z = jax.nn.sigmoid(g[:, 1 * H:2 * H] + gh[:, 1 * H:2 * H])   # inputgate
    n = jnp.tanh(g[:, 2 * H:3 * H] +
                 r * (gh[:, 2 * H:3 * H] + bhn_ref[...]))        # newgate
    hy = n + z * (hx - n)

    out_ref[0] = hy.astype(out_ref.dtype)
    h_state[...] = hy

    @pl.when(t == pl.num_programs(1) - 1)
    def _():
        hlast_ref[...] = hy.astype(hlast_ref.dtype)


def _pick_tile(n, target):
    """Largest tile <= target that divides n and is a multiple of 8 (else n)."""
    if n <= target:
        return n
    for t in range(target - target % 8, 7, -8):
        if n % t == 0:
            return t
    return n


def _round_up(x, m):
    return ((x + m - 1) // m) * m


@functools.partial(jax.jit, static_argnames=("compute_dtype",))
def gru_gcc_forward(input_feats, auxiliary_feats, hx,
                    weight_ih, weight_fh, bias_ih, bias_fh,
                    weight_hh, bias_hh, *, compute_dtype=jnp.float32):
    """Forward of GRU_with_GCC_with_shared_params.

    input_feats [B,T,D_in]; auxiliary_feats: list of [B,T,D_fk];
    hx [B,H] / [1,B,H] / None; weights in PyTorch nn.Linear layout:
    weight_ih [3H,D_in], weight_fh[k] [{2,3}H,D_fk], weight_hh [3H,H].
    Returns (output [B,T,H], h_last [B,H]).
    """
    B, T, D_in = input_feats.shape
    H = weight_hh.shape[0] // 3
    n_feats = len(auxiliary_feats)
    out_dtype = input_feats.dtype

    if hx is None:
        h0 = jnp.zeros((B, H), jnp.float32)
    else:
        h0 = hx[0] if hx.ndim == 3 else hx
    assert h0.shape == (B, H)

    # Fold all additive input-side terms into one [D, 3H] matrix per stream and
    # one combined bias row:
    #   * W_ih^T, every W_fh[k]^T (r/i chunks only, new-gate chunk zero-padded,
    #     pre-scaled by 1/K so a plain sum equals torch.stack(...).mean(0)),
    #   * bias_ih, bias_fh[k]/K,
    #   * bias_hh r/i chunks (purely additive); the new-gate chunk of bias_hh
    #     is multiplied by the reset gate so it stays in the recurrence kernel.
    wx = weight_ih.T                                             # (D_in, 3H)
    whh = weight_hh.T                                            # (H, 3H)
    b_comb = bias_ih.astype(jnp.float32) + jnp.concatenate(
        [bias_hh[:2 * H], jnp.zeros((H,), bias_hh.dtype)]).astype(jnp.float32)
    bhn = bias_hh[2 * H:].reshape(1, H).astype(jnp.float32)      # new-gate bias
    wfs = []
    for wf, bf in zip(weight_fh, bias_fh):
        assert wf.shape[0] in (2 * H, 3 * H)
        d_f = wf.shape[1]
        wfs.append(jnp.concatenate(
            [wf[:2 * H, :].T, jnp.zeros((d_f, H), wf.dtype)], axis=1) / n_feats)
        b_comb = b_comb + jnp.concatenate(
            [bf[:2 * H], jnp.zeros((H,), bf.dtype)]).astype(jnp.float32) / n_feats
    b_comb = b_comb.reshape(1, 3 * H)

    cast = lambda a: a.astype(compute_dtype)

    # Time-major, row-flattened activations (row = t*B + b): the projection
    # runs over all B*T rows at once and the recurrence slices rows per t.
    rows = T * B
    x_rows = cast(jnp.transpose(input_feats, (1, 0, 2)).reshape(rows, D_in))
    feat_rows = [cast(jnp.transpose(f, (1, 0, 2)).reshape(rows, -1))
                 for f in auxiliary_feats]

    # ---------------- Kernel 1: projection (big row-tiled matmuls) -----------
    # Row tile: lane-dense [tm, 3H] output, VMEM-budget aware (~8 MiB of
    # per-row activation+output traffic per buffer set), rows zero-padded to a
    # multiple of the tile when they do not divide evenly.
    d_total = D_in + sum(int(f.shape[1]) for f in feat_rows) + 3 * H
    budget_rows = max(8, (8 * 1024 * 1024) // (4 * d_total))
    tm = min(512, budget_rows)
    tm = max(8, tm - tm % 8)
    if rows <= tm:
        tm = rows
        rows_p = rows
    else:
        rows_p = _round_up(rows, tm)
    if rows_p != rows:
        pad = rows_p - rows
        x_rows = jnp.pad(x_rows, ((0, pad), (0, 0)))
        feat_rows = [jnp.pad(f, ((0, pad), (0, 0))) for f in feat_rows]

    in_specs = [pl.BlockSpec((tm, D_in), lambda i: (i, 0))]
    in_specs += [pl.BlockSpec((tm, f.shape[1]), lambda i: (i, 0))
                 for f in feat_rows]
    in_specs += [pl.BlockSpec((D_in, 3 * H), lambda i: (0, 0))]
    in_specs += [pl.BlockSpec((w.shape[0], 3 * H), lambda i: (0, 0))
                 for w in wfs]
    in_specs += [pl.BlockSpec((1, 3 * H), lambda i: (0, 0))]

    pre = pl.pallas_call(
        _make_proj_kernel(n_feats),
        out_shape=jax.ShapeDtypeStruct((rows_p, 3 * H), jnp.float32),
        grid_spec=pltpu.PrefetchScalarGridSpec(
            num_scalar_prefetch=0,
            grid=(rows_p // tm,),
            in_specs=in_specs,
            out_specs=pl.BlockSpec((tm, 3 * H), lambda i: (i, 0)),
        ),
        compiler_params=pltpu.CompilerParams(
            dimension_semantics=("parallel",),
            vmem_limit_bytes=64 << 20),
    )(x_rows, *feat_rows, cast(wx), *[cast(w) for w in wfs], b_comb)

    pre_tm = pre[:rows].reshape(T, B, 3 * H)   # free reshape: row = t*B + b

    # ---------------- Kernel 2: recurrence over T -----------------------------
    tb = _pick_tile(B, 256)
    out_tm, h_last = pl.pallas_call(
        _gru_recurrence_kernel,
        out_shape=(jax.ShapeDtypeStruct((T, B, H), out_dtype),
                   jax.ShapeDtypeStruct((B, H), out_dtype)),
        grid_spec=pltpu.PrefetchScalarGridSpec(
            num_scalar_prefetch=0,
            grid=(B // tb, T),
            in_specs=[
                pl.BlockSpec((1, tb, 3 * H), lambda b, t: (t, b, 0)),
                pl.BlockSpec((tb, H), lambda b, t: (b, 0)),
                pl.BlockSpec((H, 3 * H), lambda b, t: (0, 0)),
                pl.BlockSpec((1, H), lambda b, t: (0, 0)),
            ],
            out_specs=[
                pl.BlockSpec((1, tb, H), lambda b, t: (t, b, 0)),
                pl.BlockSpec((tb, H), lambda b, t: (b, 0)),
            ],
            scratch_shapes=[pltpu.VMEM((tb, H), jnp.float32)],
        ),
        compiler_params=pltpu.CompilerParams(
            dimension_semantics=("parallel", "arbitrary"),
            vmem_limit_bytes=64 << 20),
    )(pre_tm, h0.astype(jnp.float32), cast(whh), bhn)

    return jnp.transpose(out_tm, (1, 0, 2)), h_last


# ---------------------------------------------------------------------------
# Pure-JAX reference mirroring the PyTorch module exactly.
# ---------------------------------------------------------------------------
def _reference_forward(input_feats, auxiliary_feats, hx,
                       weight_ih, weight_fh, bias_ih, bias_fh,
                       weight_hh, bias_hh):
    B, T, _ = input_feats.shape
    H = weight_hh.shape[0] // 3
    hp = jax.lax.Precision.HIGHEST
    h = (jnp.zeros((B, H), jnp.float32) if hx is None
         else (hx[0] if hx.ndim == 3 else hx).astype(jnp.float32))
    outs = []
    nf = len(auxiliary_feats)
    for t in range(T):
        x = input_feats[:, t, :]
        gi = jnp.dot(x, weight_ih.T, precision=hp) + bias_ih
        gh = jnp.dot(h, weight_hh.T, precision=hp) + bias_hh
        i_r, i_i, i_n = jnp.split(gi, 3, axis=1)
        h_r, h_i, h_n = jnp.split(gh, 3, axis=1)
        if nf:
            frs, fis = [], []
            for k in range(nf):
                tmp = jnp.dot(auxiliary_feats[k][:, t, :], weight_fh[k].T,
                              precision=hp) + bias_fh[k]
                frs.append(tmp[:, :H])
                fis.append(tmp[:, H:2 * H])
            f_r = jnp.stack(frs, 0).mean(0)
            f_i = jnp.stack(fis, 0).mean(0)
            r = jax.nn.sigmoid(i_r + h_r + f_r)
            z = jax.nn.sigmoid(i_i + h_i + f_i)
        else:
            r = jax.nn.sigmoid(i_r + h_r)
            z = jax.nn.sigmoid(i_i + h_i)
        n = jnp.tanh(i_n + r * h_n)
        h = n + z * (h - n)
        outs.append(h)
    return jnp.stack(outs, axis=1), h


if __name__ == "__main__":
    jax.config.update("jax_default_matmul_precision", "highest")

    B, T, H, D_in = 2, 8, 32, 32
    feat_dims = (24, 16)
    gate_mult = (3, 2)   # first aux stream has 3H-row weight, second 2H-row

    key = jax.random.PRNGKey(0)
    ks = jax.random.split(key, 12)
    stdv = 1.0 / math.sqrt(H)
    u = lambda k, s: jax.random.uniform(k, s, jnp.float32, -stdv, stdv)

    weight_ih = u(ks[0], (3 * H, D_in)); bias_ih = u(ks[1], (3 * H,))
    weight_hh = u(ks[2], (3 * H, H));    bias_hh = u(ks[3], (3 * H,))
    weight_fh = [u(ks[4], (gate_mult[0] * H, feat_dims[0])),
                 u(ks[5], (gate_mult[1] * H, feat_dims[1]))]
    bias_fh = [u(ks[6], (gate_mult[0] * H,)),
               u(ks[7], (gate_mult[1] * H,))]

    input_feats = jax.random.normal(ks[8], (B, T, D_in), jnp.float32)
    aux_feats = [jax.random.normal(ks[9], (B, T, feat_dims[0]), jnp.float32),
                 jax.random.normal(ks[10], (B, T, feat_dims[1]), jnp.float32)]
    hx = 0.1 * jax.random.normal(ks[11], (B, H), jnp.float32)

    # f32 compute path (tight check).
    out, h_last = gru_gcc_forward(input_feats, aux_feats, hx,
                                  weight_ih, weight_fh, bias_ih, bias_fh,
                                  weight_hh, bias_hh,
                                  compute_dtype=jnp.float32)
    out = jax.block_until_ready(out)
    h_last = jax.block_until_ready(h_last)
    ref_out, ref_h = _reference_forward(input_feats, aux_feats, hx,
                                        weight_ih, weight_fh, bias_ih, bias_fh,
                                        weight_hh, bias_hh)
    assert out.shape == (B, T, H) and h_last.shape == (B, H)
    assert jnp.allclose(out, ref_out, rtol=1e-4, atol=1e-4)
    assert jnp.allclose(h_last, ref_h, rtol=1e-4, atol=1e-4)

    # No-aux-feats / hx=None path (exercises the "else" gate branch).
    out2, h2 = gru_gcc_forward(input_feats, [], None,
                               weight_ih, [], bias_ih, [],
                               weight_hh, bias_hh, compute_dtype=jnp.float32)
    out2 = jax.block_until_ready(out2)
    ref2_out, ref2_h = _reference_forward(input_feats, [], None,
                                          weight_ih, [], bias_ih, [],
                                          weight_hh, bias_hh)
    assert jnp.allclose(out2, ref2_out, rtol=1e-4, atol=1e-4)
    assert jnp.allclose(h2, ref2_h, rtol=1e-4, atol=1e-4)

    # bf16 MXU operands, f32 accumulation (loose tolerance vs f32 reference).
    out_bf, h_bf = gru_gcc_forward(input_feats, aux_feats, hx,
                                   weight_ih, weight_fh, bias_ih, bias_fh,
                                   weight_hh, bias_hh,
                                   compute_dtype=jnp.bfloat16)
    out_bf = jax.block_until_ready(out_bf)
    assert jnp.allclose(out_bf, ref_out, rtol=1e-1, atol=1.5e-1)

    print("KERNEL_OK")
</pallas_src>

<mosaic_0001>
module attributes {stable_mosaic.version = 11 : i64} {
  func.func @proj_kernel(%arg0: i32, %arg1: memref<16x32xf32, #tpu.memory_space<vmem>>, %arg2: memref<16x24xf32, #tpu.memory_space<vmem>>, %arg3: memref<16x16xf32, #tpu.memory_space<vmem>>, %arg4: memref<32x96xf32, #tpu.memory_space<vmem>>, %arg5: memref<24x96xf32, #tpu.memory_space<vmem>>, %arg6: memref<16x96xf32, #tpu.memory_space<vmem>>, %arg7: memref<1x96xf32, #tpu.memory_space<vmem>>, %arg8: memref<16x96xf32, #tpu.memory_space<vmem>>) attributes {dimension_semantics = [#tpu.dimension_semantics<parallel>], iteration_bounds = array<i64: 1>, scalar_prefetch = 0 : i64, scratch_operands = 0 : i64, tpu.core_type = #tpu.core_type<tc>, window_params = [{transform_indices = @transform_0, window_bounds = array<i64: 16, 32>}, {transform_indices = @transform_1, window_bounds = array<i64: 16, 24>}, {transform_indices = @transform_2, window_bounds = array<i64: 16, 16>}, {pipeline_mode = #tpu.pipeline_mode<synchronous>, transform_indices = @transform_3, window_bounds = array<i64: 32, 96>}, {pipeline_mode = #tpu.pipeline_mode<synchronous>, transform_indices = @transform_4, window_bounds = array<i64: 24, 96>}, {pipeline_mode = #tpu.pipeline_mode<synchronous>, transform_indices = @transform_5, window_bounds = array<i64: 16, 96>}, {pipeline_mode = #tpu.pipeline_mode<synchronous>, transform_indices = @transform_6, window_bounds = array<i64: 1, 96>}, {transform_indices = @transform_7, window_bounds = array<i64: 16, 96>}]} {
    %c0 = arith.constant 0 : index
    %c0_0 = arith.constant 0 : index
    %0 = vector.load %arg1[%c0, %c0_0] : memref<16x32xf32, #tpu.memory_space<vmem>>, vector<16x32xf32>
    %c0_1 = arith.constant 0 : index
    %c0_2 = arith.constant 0 : index
    %1 = vector.load %arg4[%c0_1, %c0_2] : memref<32x96xf32, #tpu.memory_space<vmem>>, vector<32x96xf32>
    %cst = arith.constant dense<0.000000e+00> : vector<16x96xf32>
    %2 = tpu.matmul %0, %1, %cst {dimension_numbers = #tpu.dot_dimension_numbers<[1], [0], [0], [1], [0, 0, 1, 1], [], []>, precision = #tpu.contract_precision<fp32>} : vector<16x32xf32>, vector<32x96xf32>, vector<16x96xf32> -> vector<16x96xf32>
    %c0_3 = arith.constant 0 : index
    %c0_4 = arith.constant 0 : index
    %3 = vector.load %arg2[%c0_3, %c0_4] : memref<16x24xf32, #tpu.memory_space<vmem>>, vector<16x24xf32>
    %c0_5 = arith.constant 0 : index
    %c0_6 = arith.constant 0 : index
    %4 = vector.load %arg5[%c0_5, %c0_6] : memref<24x96xf32, #tpu.memory_space<vmem>>, vector<24x96xf32>
    %cst_7 = arith.constant dense<0.000000e+00> : vector<16x96xf32>
    %5 = tpu.matmul %3, %4, %cst_7 {dimension_numbers = #tpu.dot_dimension_numbers<[1], [0], [0], [1], [0, 0, 1, 1], [], []>, precision = #tpu.contract_precision<fp32>} : vector<16x24xf32>, vector<24x96xf32>, vector<16x96xf32> -> vector<16x96xf32>
    %6 = arith.addf %2, %5 : vector<16x96xf32>
    %c0_8 = arith.constant 0 : index
    %c0_9 = arith.constant 0 : index
    %7 = vector.load %arg3[%c0_8, %c0_9] : memref<16x16xf32, #tpu.memory_space<vmem>>, vector<16x16xf32>
    %c0_10 = arith.constant 0 : index
    %c0_11 = arith.constant 0 : index
    %8 = vector.load %arg6[%c0_10, %c0_11] : memref<16x96xf32, #tpu.memory_space<vmem>>, vector<16x96xf32>
    %cst_12 = arith.constant dense<0.000000e+00> : vector<16x96xf32>
    %9 = tpu.matmul %7, %8, %cst_12 {dimension_numbers = #tpu.dot_dimension_numbers<[1], [0], [0], [1], [0, 0, 1, 1], [], []>, precision = #tpu.contract_precision<fp32>} : vector<16x16xf32>, vector<16x96xf32>, vector<16x96xf32> -> vector<16x96xf32>
    %10 = arith.addf %6, %9 : vector<16x96xf32>
    %c0_13 = arith.constant 0 : index
    %c0_14 = arith.constant 0 : index
    %11 = vector.load %arg7[%c0_13, %c0_14] : memref<1x96xf32, #tpu.memory_space<vmem>>, vector<1x96xf32>
    %12 = vector.broadcast %11 : vector<1x96xf32> to vector<16x96xf32>
    %13 = arith.addf %10, %12 : vector<16x96xf32>
    %c0_15 = arith.constant 0 : index
    %c0_16 = arith.constant 0 : index
    %14 = vector.load %arg8[%c0_15, %c0_16] : memref<16x96xf32, #tpu.memory_space<vmem>>, vector<16x96xf32>
    tpu.vector_store %arg8[%c0_15, %c0_16], %13 {strides = array<i32>} : memref<16x96xf32, #tpu.memory_space<vmem>>, vector<16x96xf32>,
    return
  }
  func.func @transform_0(%arg0: i32) -> (i32, i32) {
    %c0_i32 = arith.constant 0 : i32
    %c0_i32_0 = arith.constant 0 : i32
    return %arg0, %c0_i32 : i32, i32
  }
  func.func @transform_1(%arg0: i32) -> (i32, i32) {
    %c0_i32 = arith.constant 0 : i32
    %c0_i32_0 = arith.constant 0 : i32
    return %arg0, %c0_i32 : i32, i32
  }
  func.func @transform_2(%arg0: i32) -> (i32, i32) {
    %c0_i32 = arith.constant 0 : i32
    %c0_i32_0 = arith.constant 0 : i32
    return %arg0, %c0_i32 : i32, i32
  }
  func.func @transform_3(%arg0: i32) -> (i32, i32) {
    %c0_i32 = arith.constant 0 : i32
    %c0_i32_0 = arith.constant 0 : i32
    %c0_i32_1 = arith.constant 0 : i32
    return %c0_i32, %c0_i32_0 : i32, i32
  }
  func.func @transform_4(%arg0: i32) -> (i32, i32) {
    %c0_i32 = arith.constant 0 : i32
    %c0_i32_0 = arith.constant 0 : i32
    %c0_i32_1 = arith.constant 0 : i32
    return %c0_i32, %c0_i32_0 : i32, i32
  }
  func.func @transform_5(%arg0: i32) -> (i32, i32) {
    %c0_i32 = arith.constant 0 : i32
    %c0_i32_0 = arith.constant 0 : i32
    %c0_i32_1 = arith.constant 0 : i32
    return %c0_i32, %c0_i32_0 : i32, i32
  }
  func.func @transform_6(%arg0: i32) -> (i32, i32) {
    %c0_i32 = arith.constant 0 : i32
    %c0_i32_0 = arith.constant 0 : i32
    %c0_i32_1 = arith.constant 0 : i32
    return %c0_i32, %c0_i32_0 : i32, i32
  }
  func.func @transform_7(%arg0: i32) -> (i32, i32) {
    %c0_i32 = arith.constant 0 : i32
    %c0_i32_0 = arith.constant 0 : i32
    return %arg0, %c0_i32 : i32, i32
  }
}

module attributes {stable_mosaic.version = 11 : i64} {
  func.func @_gru_recurrence_kernel(%arg0: i32, %arg1: i32, %arg2: memref<1x2x96xf32, #tpu.memory_space<vmem>>, %arg3: memref<2x32xf32, #tpu.memory_space<vmem>>, %arg4: memref<32x96xf32, #tpu.memory_space<vmem>>, %arg5: memref<1x32xf32, #tpu.memory_space<vmem>>, %arg6: memref<1x2x32xf32, #tpu.memory_space<vmem>>, %arg7: memref<2x32xf32, #tpu.memory_space<vmem>>, %arg8: memref<2x32xf32, #tpu.memory_space<vmem>>) attributes {dimension_semantics = [#tpu.dimension_semantics<parallel>, #tpu.dimension_semantics<arbitrary>], iteration_bounds = array<i64: 1, 8>, scalar_prefetch = 0 : i64, scratch_operands = 1 : i64, tpu.core_type = #tpu.core_type<tc>, window_params = [{transform_indices = @transform_0, window_bounds = array<i64: 1, 2, 96>}, {transform_indices = @transform_1, window_bounds = array<i64: 2, 32>}, {pipeline_mode = #tpu.pipeline_mode<synchronous>, transform_indices = @transform_2, window_bounds = array<i64: 32, 96>}, {pipeline_mode = #tpu.pipeline_mode<synchronous>, transform_indices = @transform_3, window_bounds = array<i64: 1, 32>}, {transform_indices = @transform_4, window_bounds = array<i64: 1, 2, 32>}, {transform_indices = @transform_5, window_bounds = array<i64: 2, 32>}]} {
    %c0_i32 = arith.constant 0 : i32
    %0 = arith.cmpi eq, %arg1, %c0_i32 : i32
    %1 = arith.extui %0 : i1 to i32
    %c0_i32_0 = arith.constant 0 : i32
    %2 = arith.cmpi ne, %1, %c0_i32_0 : i32
    scf.if %2 {
      %c0_17 = arith.constant 0 : index
      %c0_18 = arith.constant 0 : index
      %42 = vector.load %arg3[%c0_17, %c0_18] : memref<2x32xf32, #tpu.memory_space<vmem>>, vector<2x32xf32>
      %c0_19 = arith.constant 0 : index
      %c0_20 = arith.constant 0 : index
      %43 = vector.load %arg8[%c0_19, %c0_20] : memref<2x32xf32, #tpu.memory_space<vmem>>, vector<2x32xf32>
      tpu.vector_store %arg8[%c0_19, %c0_20], %42 {strides = array<i32>} : memref<2x32xf32, #tpu.memory_space<vmem>>, vector<2x32xf32>,
    } else {
    }
    %c0 = arith.constant 0 : index
    %c0_1 = arith.constant 0 : index
    %3 = vector.load %arg8[%c0, %c0_1] : memref<2x32xf32, #tpu.memory_space<vmem>>, vector<2x32xf32>
    %c0_2 = arith.constant 0 : index
    %c0_3 = arith.constant 0 : index
    %4 = vector.load %arg4[%c0_2, %c0_3] : memref<32x96xf32, #tpu.memory_space<vmem>>, vector<32x96xf32>
    %cst = arith.constant dense<0.000000e+00> : vector<2x96xf32>
    %5 = tpu.matmul %3, %4, %cst {dimension_numbers = #tpu.dot_dimension_numbers<[1], [0], [0], [1], [0, 0, 1, 1], [], []>, precision = #tpu.contract_precision<fp32>} : vector<2x32xf32>, vector<32x96xf32>, vector<2x96xf32> -> vector<2x96xf32>
    %c0_4 = arith.constant 0 : index
    %c0_5 = arith.constant 0 : index
    %c0_6 = arith.constant 0 : index
    %6 = vector.load %arg2[%c0_4, %c0_5, %c0_6] : memref<1x2x96xf32, #tpu.memory_space<vmem>>, vector<1x2x96xf32>
    %7 = vector.shape_cast %6 : vector<1x2x96xf32> to vector<2x96xf32>
    %8 = vector.extract_strided_slice %7 {offsets = [0, 0], sizes = [2, 32], strides = [1, 1]} : vector<2x96xf32> to vector<2x32xf32>
    %9 = vector.extract_strided_slice %5 {offsets = [0, 0], sizes = [2, 32], strides = [1, 1]} : vector<2x96xf32> to vector<2x32xf32>
    %10 = arith.addf %8, %9 : vector<2x32xf32>
    %11 = arith.negf %10 : vector<2x32xf32>
    %12 = math.exp %11 : vector<2x32xf32>
    %cst_7 = arith.constant 1.000000e+00 : f32
    %13 = vector.broadcast %cst_7 : f32 to vector<2x32xf32>
    %14 = arith.addf %13, %12 : vector<2x32xf32>
    %15 = arith.divf %13, %14 : vector<2x32xf32>
    %16 = vector.extract_strided_slice %7 {offsets = [0, 32], sizes = [2, 32], strides = [1, 1]} : vector<2x96xf32> to vector<2x32xf32>
    %17 = vector.extract_strided_slice %5 {offsets = [0, 32], sizes = [2, 32], strides = [1, 1]} : vector<2x96xf32> to vector<2x32xf32>
    %18 = arith.addf %16, %17 : vector<2x32xf32>
    %19 = arith.negf %18 : vector<2x32xf32>
    %20 = math.exp %19 : vector<2x32xf32>
    %cst_8 = arith.constant 1.000000e+00 : f32
    %21 = vector.broadcast %cst_8 : f32 to vector<2x32xf32>
    %22 = arith.addf %21, %20 : vector<2x32xf32>
    %23 = arith.divf %21, %22 : vector<2x32xf32>
    %24 = vector.extract_strided_slice %7 {offsets = [0, 64], sizes = [2, 32], strides = [1, 1]} : vector<2x96xf32> to vector<2x32xf32>
    %25 = vector.extract_strided_slice %5 {offsets = [0, 64], sizes = [2, 32], strides = [1, 1]} : vector<2x96xf32> to vector<2x32xf32>
    %c0_9 = arith.constant 0 : index
    %c0_10 = arith.constant 0 : index
    %26 = vector.load %arg5[%c0_9, %c0_10] : memref<1x32xf32, #tpu.memory_space<vmem>>, vector<1x32xf32>
    %27 = vector.broadcast %26 : vector<1x32xf32> to vector<2x32xf32>
    %28 = arith.addf %25, %27 : vector<2x32xf32>
    %29 = arith.mulf %15, %28 : vector<2x32xf32>
    %30 = arith.addf %24, %29 : vector<2x32xf32>
    %31 = math.tanh %30 : vector<2x32xf32>
    %32 = arith.subf %3, %31 : vector<2x32xf32>
    %33 = arith.mulf %23, %32 : vector<2x32xf32>
    %34 = arith.addf %31, %33 : vector<2x32xf32>
    %c0_11 = arith.constant 0 : index
    %c0_12 = arith.constant 0 : index
    %c0_13 = arith.constant 0 : index
    %35 = vector.load %arg6[%c0_11, %c0_12, %c0_13] : memref<1x2x32xf32, #tpu.memory_space<vmem>>, vector<1x2x32xf32>
    %36 = vector.shape_cast %35 : vector<1x2x32xf32> to vector<2x32xf32>
    %37 = vector.shape_cast %34 : vector<2x32xf32> to vector<1x2x32xf32>
    tpu.vector_store %arg6[%c0_11, %c0_12, %c0_13], %37 {strides = array<i32>} : memref<1x2x32xf32, #tpu.memory_space<vmem>>, vector<1x2x32xf32>,
    %c0_14 = arith.constant 0 : index
    %c0_15 = arith.constant 0 : index
    %38 = vector.load %arg8[%c0_14, %c0_15] : memref<2x32xf32, #tpu.memory_space<vmem>>, vector<2x32xf32>
    tpu.vector_store %arg8[%c0_14, %c0_15], %34 {strides = array<i32>} : memref<2x32xf32, #tpu.memory_space<vmem>>, vector<2x32xf32>,
    %c7_i32 = arith.constant 7 : i32
    %39 = arith.cmpi eq, %arg1, %c7_i32 : i32
    %40 = arith.extui %39 : i1 to i32
    %c0_i32_16 = arith.constant 0 : i32
    %41 = arith.cmpi ne, %40, %c0_i32_16 : i32
    scf.if %41 {
      %c0_17 = arith.constant 0 : index
      %c0_18 = arith.constant 0 : index
      %42 = vector.load %arg7[%c0_17, %c0_18] : memref<2x32xf32, #tpu.memory_space<vmem>>, vector<2x32xf32>
      tpu.vector_store %arg7[%c0_17, %c0_18], %34 {strides = array<i32>} : memref<2x32xf32, #tpu.memory_space<vmem>>, vector<2x32xf32>,
    } else {
    }
    return
  }
  func.func @transform_0(%arg0: i32, %arg1: i32) -> (i32, i32, i32) {
    %c0_i32 = arith.constant 0 : i32
    %c0_i32_0 = arith.constant 0 : i32
    return %arg1, %arg0, %c0_i32 : i32, i32, i32
  }
  func.func @transform_1(%arg0: i32, %arg1: i32) -> (i32, i32) {
    %c0_i32 = arith.constant 0 : i32
    %c0_i32_0 = arith.constant 0 : i32
    return %arg0, %c0_i32 : i32, i32
  }
  func.func @transform_2(%arg0: i32, %arg1: i32) -> (i32, i32) {
    %c0_i32 = arith.constant 0 : i32
    %c0_i32_0 = arith.constant 0 : i32
    %c0_i32_1 = arith.constant 0 : i32
    return %c0_i32, %c0_i32_0 : i32, i32
  }
  func.func @transform_3(%arg0: i32, %arg1: i32) -> (i32, i32) {
    %c0_i32 = arith.constant 0 : i32
    %c0_i32_0 = arith.constant 0 : i32
    %c0_i32_1 = arith.constant 0 : i32
    return %c0_i32, %c0_i32_0 : i32, i32
  }
  func.func @transform_4(%arg0: i32, %arg1: i32) -> (i32, i32, i32) {
    %c0_i32 = arith.constant 0 : i32
    %c0_i32_0 = arith.constant 0 : i32
    return %arg1, %arg0, %c0_i32 : i32, i32, i32
  }
  func.func @transform_5(%arg0: i32, %arg1: i32) -> (i32, i32) {
    %c0_i32 = arith.constant 0 : i32
    %c0_i32_0 = arith.constant 0 : i32
    return %arg0, %c0_i32 : i32, i32
  }
}

</mosaic_0001>

<bundles_post_ra>
// kernel: gru_gcc_forward.3
= control target key start
LH: loop header
LB: loop body
LE: loop exit
PB: predicated region body
PF: predicated region fallthrough
CT: control target
= control target key end

     0   :  { %s1899_s0 = inlined_call_operand.hbm [shape: f32[8,2,96], index: 0, kind: input, shape index: {}]   ;;  %s1900_s1 = inlined_call_operand.hbm [shape: f32[2,32], index: 1, kind: input, shape index: {}]   ;;  %s1901_s2 = inlined_call_operand.hbm [shape: f32[32,96], index: 2, kind: input, shape index: {}]   ;;  %s1902_s3 = inlined_call_operand.hbm [shape: f32[1,32], index: 3, kind: input, shape index: {}]   ;;  %s1903_s4 = inlined_call_operand.hbm [shape: f32[8,2,32], index: 4, kind: output, shape index: {0}]   ;;  %s1904_s5 = inlined_call_operand.hbm [shape: f32[2,32], index: 5, kind: output, shape index: {1}]  }
   0x1   :  { %1910 = sst [smem:[#allocation19_spill]] %s1900_s1 }
   0x2   :  { %11 = vsyncpa [#allocation4], 0 }
   0x3   :  { %13 = vsyncpa [#allocation4 + $0x1], 0 }
   0x4   :  { %14 = vsyncpa [#allocation7], 0 }
   0x5   :  { %15 = vsyncpa [#allocation10], 0 }
   0x6   :  { %16 = vsyncpa [#allocation5], 0 }
   0x7   :  { %18 = vsyncpa [#allocation5 + $0x1], 0 }
   0x8   :  { %19 = vsyncpa [#allocation13], 0  ;;  %s1575_s18 = smov 0   ;;  %s1577_s19 = smov 0  }
   0x9   :  { %s1579_s20 = smov 0   ;;  %s1581_s21 = smov 0  }
   0xa   :  { %s1583_s22 = smov 0   ;;  %s1585_s23 = smov 0  }
   0xb LB: > { %s1017_s24 = sadd.s32 4294967295, %s1530_s23   ;;  %s1018_s25 = sadd.s32 4294967294, %s1530_s23   ;;  %s1530_s23 = sphi %s1585_s23, %s25_s23   ;;  %s1526_s22 = sphi %s1583_s22, %s1931_s22   ;;  %s1522_s21 = sphi %s1581_s21, %s1930_s21   ;;  %s1518_s20 = sphi %s1579_s20, %s1929_s20   ;;  %s1514_s19 = sphi %s1577_s19, %s1928_s19   ;;  %s1510_s18 = sphi %s1575_s18, %s1927_s18  }
   0xc   : > { %p59_p0 = scmp.ne.s32.totalorder %s1514_s19, %s1510_s18  ;;  %p1609_p1 = scmp.eq.s32.totalorder %s1017_s24, 0 }
   0xd   : > { %p1613_p2 = scmp.eq.s32.totalorder %s1017_s24, 7  ;;  %p159_p3 = scmp.eq.s32.totalorder %s1018_s25, 7 }
   0xe   : > { %s1911_s26 = scalar_select %p1609_p1, 1, 0 }
   0xf   : > { %s1912_s27 = scalar_select %p1613_p2, 1, 0 }
  0x10   : > { %p1619_p4 = por %p1609_p1, %p59_p0  ;;  %p1019_p5 = scmp.ge.s32.totalorder %s1530_s23, 1 }
  0x11   : > { %p1624_p6 = por %p159_p3, %p59_p0  ;;  %p192_p7 = scmp.lt.s32.totalorder %s1530_s23, 9 }
  0x12   : > { %s1913_s28 = scalar_select %p1619_p4, 1, 0 }
  0x13   : > { %s1914_s29 = scalar_select %p1624_p6, 1, 0 }
  0x14   : > { %p1629_p8 = pnand %p1019_p5, %p192_p7  ;;  %s1532_s6 = smov [#allocation6]  }
  0x15   : > { %s207_s7 = sshll.u32 %s1532_s6, 4  ;;  %s1533_s8 = smov [#allocation8]   ;;  %s208_s7 = int_to_ptr.vmem [resolvable:$true] %s207_s7 }
  0x16   : > { %s1915_s30 = scalar_select %p1629_p8, 1, 0 }
  0x17   : > { %p1203_p9 = pneg %p1629_p8  ;;  %s217_s9 = sshll.u32 %s1533_s8, 4  ;;  %s1641_s9 = int_to_ptr.vmem [resolvable:$true] %s217_s9 }
  0x18   : > { %s1534_s11 = smov [#allocation9]   ;;  %s1917_s1 = sld [smem:[#allocation19_spill]] }
  0x19   : > { %p1637_p10 = pnand %p1203_p9, %p1609_p1  ;;  %s1643_s12 = sshll.u32 %s1534_s11, 4  ;;  %s232_s12 = int_to_ptr.vmem [resolvable:$true] %s1643_s12 }
  0x1b   : > { %p1653_p12 = pneg %p1637_p10 }
  0x1e   : > { %s1296_s15 = scalar_lea.hbm %s1917_s1, 32 }
  0x1f   : > { %p1297_p11 = scmp.ne.s32.totalorder %s1917_s1, %s1296_s15  ;;  %p1303_p3 = scmp.lt.u32.totalorder %s1296_s15, %s1917_s1 }
  0x21   : > { %p1299_p13 = pnand %p1653_p12, %p1297_p11 }
  0x23   : > { %p1300_p0 = pneg %p1299_p13 }
  0x25   : > { %p1305_p5 = pnand %p1303_p3, %p1300_p0 }
  0x27   : > { %1308 = shalt.err (!%p1305_p5)
}
  0x28   : > { %s1309_s8 = scalar_lea.vmem %s208_s7, 32  ;;  %p1317_p1 = scmp.lt.s32.totalorder %s208_s7, %s208_s7 }
  0x29   : > { %p1310_p7 = scmp.ne.s32.totalorder %s208_s7, %s1309_s8  ;;  %p1318_p4 = scmp.lt.s32.totalorder %s1309_s8, %s1309_s8 }
  0x2b   : > { %p1312_p9 = pnand %p1310_p7, %p1653_p12  ;;  %p1319_p8 = por %p1318_p4, %p1317_p1 }
  0x2d   : > { %p1313_p6 = pneg %p1312_p9 }
  0x2f   : > { %p1320_p2 = pnand %p1319_p8, %p1313_p6 }
  0x31   : > { %1323 = shalt.err (!%p1320_p2)
}
  0x32   : > { %1206 = dma.hbm_to_vmem [thread:$0]  (!%p1637_p10), %s1917_s1, 32, %s208_s7, [#allocation7]  }
  0x33   : > { %s1324_s16 = scalar_lea.hbm %s1901_s2, 512 }
  0x34   : > { %p1325_p11 = scmp.ne.s32.totalorder %s1901_s2, %s1324_s16  ;;  %p1331_p2 = scmp.lt.u32.totalorder %s1324_s16, %s1901_s2 }
  0x36   : > { %p1327_p13 = pnand %p1325_p11, %p1653_p12 }
  0x38   : > { %p1328_p1 = pneg %p1327_p13 }
  0x3a   : > { %p1333_p4 = pnand %p1331_p2, %p1328_p1 }
  0x3c   : > { %1336 = shalt.err (!%p1333_p4)
}
  0x3d   : > { %s1337_s7 = scalar_lea.vmem %s1641_s9, 512  ;;  %p1345_p3 = scmp.lt.s32.totalorder %s1641_s9, %s1641_s9 }
  0x3e   : > { %p1338_p6 = scmp.ne.s32.totalorder %s1641_s9, %s1337_s7  ;;  %p1346_p5 = scmp.lt.s32.totalorder %s1337_s7, %s1337_s7 }
  0x40   : > { %p1340_p8 = pnand %p1338_p6, %p1653_p12  ;;  %p1347_p7 = por %p1346_p5, %p1345_p3 }
  0x42   : > { %p1341_p0 = pneg %p1340_p8 }
  0x44   : > { %p1348_p9 = pnand %p1347_p7, %p1341_p0 }
  0x46   : > { %1351 = shalt.err (!%p1348_p9)
}
  0x47   : > { %s1535_s11 = smov 128   ;;  %s1536_s13 = smov 8  }
  0x48   : > { %1209 = dma.hbm_to_vmem [thread:$0]  (!%p1637_p10), %s1901_s2, 512, %s1641_s9, [#allocation7], %s1535_s11, %s1535_s11, %s1536_s13  }
  0x49   : > { %s1352_s25 = scalar_lea.hbm %s1902_s3, 16 }
  0x4a   : > { %p1353_p11 = scmp.ne.s32.totalorder %s1902_s3, %s1352_s25  ;;  %p1359_p2 = scmp.lt.u32.totalorder %s1352_s25, %s1902_s3 }
  0x4c   : > { %p1355_p13 = pnand %p1353_p11, %p1653_p12 }
  0x4e   : > { %p1356_p1 = pneg %p1355_p13 }
  0x50   : > { %p1361_p4 = pnand %p1359_p2, %p1356_p1 }
  0x52   : > { %1364 = shalt.err (!%p1361_p4)
}
  0x53   : > { %s1365_s14 = scalar_lea.vmem %s232_s12, 16  ;;  %s1372_s9 = scalar_lea.vmem %s232_s12, 32 }
  0x54   : > { %p1366_p6 = scmp.ne.s32.totalorder %s232_s12, %s1365_s14  ;;  %p1373_p3 = scmp.lt.s32.totalorder %s232_s12, %s232_s12 }
  0x55   : > { %p1374_p5 = scmp.lt.s32.totalorder %s1372_s9, %s1365_s14 }
  0x56   : > { %p1368_p8 = pnand %p1366_p6, %p1653_p12 }
  0x57   : > { %p1375_p7 = por %p1374_p5, %p1373_p3 }
  0x58   : > { %p1369_p0 = pneg %p1368_p8 }
  0x5a   : > { %p1376_p9 = pnand %p1375_p7, %p1369_p0 }
  0x5c   : > { %1379 = shalt.err (!%p1376_p9)
}
  0x5d   : > { %1212 = dma.hbm_to_vmem [thread:$0]  (!%p1637_p10), %s1902_s3, 16, %s232_s12, [#allocation10]  }
  0x5e   : > { %s46_s1 = sadd.s32 1, %s1518_s20  ;;  %s34_s24 = sadd.s32 1, %s1526_s22 }
  0x5f   : > { %p53_p12 = scmp.ne.s32.totalorder %s1518_s20, %s1514_s19  ;;  %p35_p11 = scmp.ge.s32.totalorder %s34_s24, 8 }
  0x60   : > { %p54_p13 = scmp.eq.s32.totalorder %s1530_s23, 0  ;;  %p1919_p1 = scmp.ne.s32.totalorder %s1912_s27, 0 }
  0x61   : > { %p1224_p4 = scmp.lt.s32.totalorder %s1530_s23, 8  ;;  %s1933_s24 = smov (%p35_p11, %s34_s24), 0 }
  0x62   : > { %p1718_p2 = por %p1919_p1, %p53_p12  ;;  %p55_p6 = por %p54_p13, %p53_p12 }
  0x63   : > { %s242_s15 = sand.u32 1, %s1518_s20   ;;  %s41_s16 = ssub.s32 %s1526_s22, %s1933_s24 }
  0x64   : > { %p44_p8 = scmp.eq.s32.totalorder %s41_s16, 0  ;;  %s1024_s12 = sshll.u32 %s242_s15, 1 }
  0x65   : > { %s1025_s17 = sshll.u32 %s1526_s22, 5  ;;  %s246_s14 = scalar_lea.vmem [#allocation3], %s1024_s12 }
  0x66   : > { %s1730_s25 = scalar_select %p44_p8, %s1518_s20, %s46_s1  }
  0x67   : > { %s1735_s7 = scalar_lea.hbm %s1899_s0, %s1025_s17  ;;  %s254_s9 = sshll.u32 %s246_s14, 4  ;;  %s1737_s9 = int_to_ptr.vmem [resolvable:$true] %s254_s9 }
  0x68   : > { %p1741_p10 = pnand %p1224_p4, %p55_p6  ;;  %s243_s13 = scalar_lea.sflag [#allocation4], %s242_s15 }
  0x69   : > { %s1380_s1 = scalar_lea.hbm %s1735_s7, 32  ;;  %s1385_s17 = scalar_lea.hbm %s1899_s0, 256 }
  0x6a   : > { %p1381_p0 = scmp.ne.s32.totalorder %s1735_s7, %s1380_s1  ;;  %p1382_p3 = pneg %p1741_p10 }
  0x6b   : > { %p1386_p9 = scmp.lt.u32.totalorder %s1735_s7, %s1899_s0  ;;  %p1387_p12 = scmp.lt.u32.totalorder %s1385_s17, %s1380_s1 }
  0x6c   : > { %p1383_p5 = pnand %p1382_p3, %p1381_p0  ;;  %p1389_p13 = scmp.lt.u32.totalorder %s1380_s1, %s1735_s7 }
  0x6d   : > { %p1388_p11 = por %p1387_p12, %p1386_p9 }
  0x6e   : > { %p1384_p7 = pneg %p1383_p5 }
  0x6f   : > { %p1390_p1 = por %p1389_p13, %p1388_p11 }
  0x71   : > { %p1391_p4 = pnand %p1390_p1, %p1384_p7 }
  0x73   : > { %1394 = shalt.err (!%p1391_p4)
}
  0x74   : > { %s1395_s15 = scalar_lea.vmem %s1737_s9, 32  ;;  %s1537_s14 = smov [#allocation3]  }
  0x75   : > { %p1396_p6 = scmp.ne.s32.totalorder %s1737_s9, %s1395_s15  ;;  %s1400_s16 = sshll.u32 %s1537_s14, 4  ;;  %s1401_s16 = int_to_ptr.vmem [resolvable:$false] %s1400_s16 }
  0x76   : > { %s1402_s12 = scalar_lea.vmem %s1401_s16, 64  ;;  %p1403_p5 = scmp.lt.s32.totalorder %s1737_s9, %s1401_s16 }
  0x77   : > { %p1398_p8 = pnand %p1396_p6, %p1382_p3  ;;  %p1404_p9 = scmp.lt.s32.totalorder %s1402_s12, %s1395_s15 }
  0x79   : > { %p1399_p0 = pneg %p1398_p8  ;;  %p1405_p12 = por %p1404_p9, %p1403_p5 }
  0x7b   : > { %p1406_p11 = pnand %p1405_p12, %p1399_p0 }
  0x7d   : > { %1409 = shalt.err (!%p1406_p11)
}
  0x7e   : > { %1216 = dma.hbm_to_vmem [thread:$0]  (!%p1741_p10), %s1735_s7, 32, %s1737_s9, %s243_s13  }
  0x7f   : > { %p1922_p7 = scmp.ne.s32.totalorder %s1915_s30, 0 }
  0x80   : > { %s1773_s1 = sand.u32 (!%p1922_p7), 1, %s1514_s19   ;;  %p1923_p3 = scmp.ne.s32.totalorder (!%p1922_p7), %s1913_s28, 0 }
  0x81   : > { %263 = sbr.rel (%p1922_p7) target bundleno = 1160 (0x488), region = 36  ;;  %s1027_s17 = sshll.u32 (!%p1922_p7), %s1773_s1, 1 }
  0x82   : > { %s266_s6 = scalar_lea.sflag (!%p1922_p7), [#allocation4], %s1773_s1  ;;  %s1777_s8 = scalar_lea.vmem (!%p1922_p7), [#allocation3], %s1027_s17 }
  0x88   : > { %1489 = dma.done.wait (%p1923_p3), %s266_s6, 32  }
  0x89   : > { %1491 = vsyncadd (%p1923_p3), %s266_s6, 4294967264  ;;  %p1924_p10 = scmp.ne.s32.totalorder %s1911_s26, 0 }
  0x8b   : > { %1493 = dma.done.wait (%p1924_p10), [#allocation7], 544  }
  0x8c   : > { %1495 = vsyncadd (%p1924_p10), [#allocation7], 4294966752 }
  0x8d   : > { %1497 = dma.done.wait (%p1924_p10), [#allocation10], 16  }
  0x8e   : > { %1499 = vsyncadd (%p1924_p10), [#allocation10], 4294967280  ;;  %s1791_s30 = scalar_lea.vmem [#allocation11], %s1027_s17  ;;  %p1032_p13 = scmp.ne.s32.totalorder %s1522_s21, 0 }
  0x8f   : > { %v312_v0 = vld [vmem:[#allocation6] sm:$0x3] (!%p1032_p13)  ;;  %vm313_vm0 = vcmask (!%p1032_p13), 254976  }
  0x90   : > { %311 = sbr.rel (%p1032_p13) target bundleno = 151 (0x97), region = 56  ;;  %314 = vst.msk [vmem:[#allocation2] sm:$0x3] (!%p1032_p13), %vm313_vm0, %v312_v0 }
  0x97 PF: > { %v316_v1 = vld [vmem:[#allocation8] sm:$0xff]  ;;  %v317_v2 = vld [vmem:[#allocation8 + $0x8] sm:$0xff]  ;;  %v318_v3 = vld [vmem:[#allocation8 + $0x10] sm:$0xff]  ;;  %v1538_v4 = vmov 0.0|0.0   ;;  %vm1539_vm1 = vmmov 0   ;;  %v1540_v11 = vmov 0.0  }
  0x98   : > { %1138 = vmatprep.subr.bf16.mxu1 %v1538_v4  ;;  %1156 = vmatprep.subr.bf16.mxu0 %v1538_v4  ;;  %v325_v5 = vand.u32 4294901760, %v316_v1  ;;  %v328_v6 = vand.u32 4294901760, %v317_v2  ;;  %v319_v7 = vld [vmem:[#allocation8 + $0x18] sm:$0xff]  ;;  %v331_v8 = vand.u32 4294901760, %v318_v3  ;;  %vm320_vm2 = vcmask 261120   ;;  %s1541_s26 = smov 64  }
  0x99   : > { %v1796_v9 = vld [vmem:[#allocation2] sm:$0x3]  ;;  %v334_v10 = vand.u32 4294901760, %v319_v7  ;;  %1080 = vmatprep.mubr.msk.f32.mxu1 %vm1539_vm1, %v1540_v11  ;;  %1113 = vmatprep.mubr.msk.f32.mxu0 %vm1539_vm1, %v1540_v11  ;;  %v1034_v12 = vld [vmem:[#allocation9] ss:$0 sm:$0xff]  ;;  %s1542_s28 = smov 32  }
  0x9a   : > { %v1139_v13 = vpack.c.bf16 %v328_v6, %v325_v5  ;;  %v405_v14 = vsub.f32 %v316_v1, %v325_v5  ;;  %v412_v15 = vsub.f32 %v317_v2, %v328_v6  ;;  %v419_v16 = vsub.f32 %v318_v3, %v331_v8  ;;  %823 = vrot.lane.b32.xlu0 %v1034_v12, %s1541_s26  ;;  %v809_v50 = vld [vmem:[%s1777_s8] sm:$0x3]  ;;  %p1035_p1 = scmp.ne.s32.totalorder %s1522_s21, 7 }
  0x9b   : > { %v1142_v17 = vpack.c.bf16 %v334_v10, %v331_v8  ;;  %v426_v18 = vsub.f32 %v319_v7, %v334_v10  ;;  %v322_v19 = vsel %vm320_vm2, %v1796_v9, 0  ;;  %vm857_vm3 = vcmask 254976  }
  0x9c   : > { %1140 = vmatpush3.bf16.msra.mxu1 %v1139_v13  ;;  %1158 = vmatpush3.bf16.msra.mxu0 %v1139_v13  ;;  %v393_v20 = vand.u32 4294901760, %v322_v19  ;;  %v406_v21 = vand.u32 4294901760, %v405_v14  ;;  %v413_v22 = vand.u32 4294901760, %v412_v15  ;;  %v420_v23 = vand.u32 4294901760, %v419_v16 }
  0x9d   : > { %1141 = vmatprep.subr.bf16.mxu1 %v1538_v4  ;;  %1159 = vmatprep.subr.bf16.mxu0 %v1538_v4  ;;  %v427_v24 = vand.u32 4294901760, %v426_v18  ;;  %v1151_v41 = vpack.c.bf16 %v412_v15, %v405_v14  ;;  %v1154_v42 = vpack.c.bf16 %v426_v18, %v419_v16 }
  0x9e   : > { %v394_v25 = vsub.f32 %v322_v19, %v393_v20  ;;  %v407_v26 = vsub.f32 %v405_v14, %v406_v21  ;;  %v414_v27 = vsub.f32 %v412_v15, %v413_v22  ;;  %v421_v28 = vsub.f32 %v419_v16, %v420_v23 }
  0x9f   : > { %v428_v29 = vsub.f32 %v426_v18, %v427_v24  ;;  %v1163_v33 = vpack.c.bf16 %v413_v22, %v406_v21  ;;  %v1166_v39 = vpack.c.bf16 %v427_v24, %v420_v23 }
  0xa0   : > { %1143 = vmatpush3.bf16.msra.mxu1 %v1142_v17  ;;  %1161 = vmatpush3.bf16.msra.mxu0 %v1142_v17  ;;  %v395_v30 = vand.u32 4294901760, %v394_v25  ;;  %v408_v31 = vand.u32 4294901760, %v407_v26  ;;  %v415_v32 = vand.u32 4294901760, %v414_v27  ;;  %v422_v36 = vand.u32 4294901760, %v421_v28 }
  0xa1   : > { %1144 = vmatprep.subr.bf16.mxu1 %v1538_v4  ;;  %1162 = vmatprep.subr.bf16.mxu0 %v1538_v4  ;;  %v429_v37 = vand.u32 4294901760, %v428_v29 }
  0xa2   : > { %v396_v34 = vsub.f32 %v394_v25, %v395_v30  ;;  %v1145_v35 = vpack.c.bf16 %v415_v32, %v408_v31 }
  0xa3   : > { %1114 = vmatmul.mubr.f32.vlgmr.msra.gmra.mrb[0].mxu0 %v395_v30  ;;  %v1148_v40 = vpack.c.bf16 %v429_v37, %v422_v36 }
  0xa4   : > { %v397_v38 = vand.u32 4294901760, %v396_v34  ;;  %1164 = vmatpush3.bf16.msra.mxu0 %v1163_v33  ;;  %1124 = vmatprep.mubr.msk.f32.mxu0 %vm1539_vm1, %v1540_v11 }
  0xa5   : > { %1165 = vmatprep.subr.bf16.mxu0 %v1538_v4 }
  0xa6   : > { %1081 = vmatmul.mubr.f32.vlgmr.msra.gmra.mrb[0].mxu1 %v397_v38 }
  0xa7   : > { %1146 = vmatpush3.bf16.msra.mxu1 %v1145_v35  ;;  %1091 = vmatprep.mubr.msk.f32.mxu1 %vm1539_vm1, %v1540_v11 }
  0xa8   : > { %1147 = vmatprep.subr.bf16.mxu1 %v1538_v4  ;;  %1167 = vmatpush3.bf16.msra.mxu0 %v1166_v39 }
  0xa9   : > { %1168 = vmatprep.subr.bf16.mxu0 %v1538_v4 }
  0xab   : > { %1149 = vmatpush3.bf16.msra.mxu1 %v1148_v40  ;;  %1125 = vmatmul.mubr.f32.vlgmr.msra.gmra.mrb[0].mxu0 %v393_v20 }
  0xac   : > { %1150 = vmatprep.subr.bf16.mxu1 %v1538_v4  ;;  %1170 = vmatpush3.bf16.msra.mxu0 %v1139_v13 }
  0xad   : > { %1171 = vmatprep.subr.bf16.mxu0 %v1538_v4  ;;  %1135 = vmatprep.mubr.msk.f32.mxu0 %vm1539_vm1, %v1540_v11 }
  0xae   : > { %1092 = vmatmul.mubr.f32.vlgmr.msra.gmra.mrb[0].mxu1 %v393_v20 }
  0xaf   : > { %1152 = vmatpush3.bf16.msra.mxu1 %v1151_v41  ;;  %1102 = vmatprep.mubr.msk.f32.mxu1 %vm1539_vm1, %v1540_v11 }
  0xb0   : > { %1153 = vmatprep.subr.bf16.mxu1 %v1538_v4  ;;  %1173 = vmatpush3.bf16.msra.mxu0 %v1142_v17 }
  0xb3   : > { %1155 = vmatpush3.bf16.msra.mxu1 %v1154_v42  ;;  %1136 = vmatmul.mubr.f32.vlgmr.msra.gmra.mrb[0].mxu0 %v393_v20 }
  0xb6   : > { %1103 = vmatmul.mubr.f32.vlgmr.msra.gmra.mrb[0].mxu1 %v394_v25 }
 0x10c   : > { %v824_v46 = vpop.permute.xlu0 %823 }
 0x186   : > { %v805_v43 = vpop.f32.mrb[0].mxu0 }
 0x187   : > { %v1137_v44 = vpop.f32.mrb[1].mxu0 }
 0x189   : > { %v570_v45 = vpop.f32.mrb[0].mxu1 }
 0x18a   : > { %v1174_v47 = vadd.f32 %v805_v43, %v570_v45  ;;  %v1104_v48 = vpop.f32.mrb[1].mxu1 }
 0x18c   : > { %v826_v49 = vadd.f32 %v1174_v47, %v824_v46  ;;  %v810_v51 = vadd.f32 %v1174_v47, %v809_v50 }
 0x18e   : > { %828 = vrot.lane.b32.xlu0 %v826_v49, %s1541_s26  ;;  %v1033_v52 = vmul.f32 -1.442695, %v810_v51 }
 0x190   : > { %1290 = vpow2.f32 %v1033_v52 }
 0x19a   : > { %v1291_v53 = vpop.eup %1290 }
 0x19b   : > { %v814_v54 = vadd.f32 1.0, %v1291_v53 }
 0x19d   : > { %1292 = vrcp.f32 %v814_v54 }
 0x1a7   : > { %v1293_v55 = vpop.eup %1292 }
 0x200   : > { %v829_v56 = vpop.permute.xlu0 %828 }
 0x201   : > { %v831_v57 = vmul.f32 %v1293_v55, %v829_v56 }
 0x203   : > { %833 = vrot.lane.b32.xlu1 %v831_v57, %s1541_s26 }
 0x275   : > { %v834_v58 = vpop.permute.xlu1 %833 }
 0x276   : > { %v836_v59 = vadd.f32 %v834_v58, %v809_v50 }
 0x278   : > { %1294 = vtanh.f32 %v836_v59 }
 0x282   : > { %v1295_v60 = vpop.eup %1294 }
 0x283   : > { %839 = vrot.lane.b32.xlu1 %v1295_v60, %s1541_s26 }
 0x2f5   : > { %v840_v61 = vpop.permute.xlu1 %839 }
 0x2f6   : > { %v842_v62 = vsub.f32 %v1796_v9, %v840_v61 }
 0x2f8   : > { %844 = vrot.lane.b32.xlu0 %v842_v62, %s1542_s28 }
 0x36a   : > { %v845_v63 = vpop.permute.xlu0 %844 }
 0x36b   : > { %v847_v0 = vmul.f32 %v1293_v55, %v845_v63 }
 0x36d   : > { %849 = vrot.lane.b32.xlu1 %v847_v0, %s1542_s28 }
 0x3df   : > { %v850_v1 = vpop.permute.xlu1 %849 }
 0x3e0   : > { %v852_v2 = vadd.f32 %v1295_v60, %v850_v1 }
 0x3e2   : > { %854 = vrot.lane.b32.xlu0 %v852_v2, %s1541_s26 }
 0x44f   : > { %863 = sbr.rel (%p1035_p1) target bundleno = 1111 (0x457), region = 60 }
 0x454   : > { %v855_v3 = vpop.permute.xlu0 %854 }
 0x455   : > { %858 = vst.msk [vmem:[%s1791_s30] sm:$0x3] %vm857_vm3, %v855_v3  ;;  %859 = vst.msk [vmem:[#allocation2] sm:$0x3] %vm857_vm3, %v855_v3 }
 0x456   : > { %864 = vst.msk [vmem:[#allocation12] sm:$0x3] %vm857_vm3, %v855_v3 }
 0x457 PF: > { %s1037_s7 = sshll.u32 %s1522_s21, 5  ;;  %s880_s15 = sshll.u32 %s1791_s30, 4  ;;  %s881_s15 = int_to_ptr.vmem [resolvable:$true] %s880_s15 }
 0x458   : > { %s1834_s13 = scalar_lea.hbm %s1903_s4, %s1037_s7  ;;  %s866_s14 = scalar_lea.sflag [#allocation5], %s1773_s1 }
 0x459   : > { %s1410_s16 = scalar_lea.vmem %s881_s15, 32  ;;  %s1543_s12 = smov [#allocation11]  }
 0x45a   : > { %p1411_p4 = scmp.ne.s32.totalorder %s881_s15, %s1410_s16  ;;  %s1414_s17 = sshll.u32 %s1543_s12, 4  ;;  %s1415_s17 = int_to_ptr.vmem [resolvable:$false] %s1414_s17 }
 0x45b   : > { %s1416_s6 = scalar_lea.vmem %s1415_s17, 64  ;;  %p1417_p0 = scmp.lt.s32.totalorder %s881_s15, %s1415_s17 }
 0x45c   : > { %p1412_p6 = pnand %p1411_p4, %p1718_p2  ;;  %p1418_p5 = scmp.lt.s32.totalorder %s1416_s6, %s1410_s16 }
 0x45e   : > { %p1413_p8 = pneg %p1412_p6  ;;  %p1419_p9 = por %p1418_p5, %p1417_p0 }
 0x460   : > { %p1420_p12 = pnand %p1419_p9, %p1413_p8 }
 0x462   : > { %1423 = shalt.err (!%p1420_p12)
}
 0x463   : > { %s1424_s21 = scalar_lea.hbm %s1834_s13, 32  ;;  %s1428_s30 = scalar_lea.hbm %s1903_s4, 256 }
 0x464   : > { %p1425_p11 = scmp.ne.s32.totalorder %s1834_s13, %s1424_s21  ;;  %p1429_p10 = scmp.lt.u32.totalorder %s1834_s13, %s1903_s4 }
 0x465   : > { %p1430_p13 = scmp.lt.u32.totalorder %s1428_s30, %s1424_s21  ;;  %p1432_p4 = scmp.lt.u32.totalorder %s1424_s21, %s1834_s13 }
 0x466   : > { %p1426_p7 = pnand %p1425_p11, %p1718_p2 }
 0x467   : > { %p1431_p1 = por %p1430_p13, %p1429_p10 }
 0x468   : > { %p1427_p3 = pneg %p1426_p7 }
 0x469   : > { %p1433_p6 = por %p1432_p4, %p1431_p1 }
 0x46b   : > { %p1434_p8 = pnand %p1433_p6, %p1427_p3 }
 0x46d   : > { %1437 = shalt.err (!%p1434_p8)
}
 0x46e   : > { %1197 = dma.vmem_to_hbm [thread:$0]  (%p1718_p2), %s881_s15, 32, %s1834_s13, %s866_s14  }
 0x46f   : > { %s1544_s7 = smov [#allocation12]   ;;  %p1925_p5 = scmp.ne.s32.totalorder %s1912_s27, 0 }
 0x470   : > { %s893_s9 = sshll.u32 %s1544_s7, 4  ;;  %s894_s9 = int_to_ptr.vmem [resolvable:$true] %s893_s9 }
 0x471   : > { %s1438_s11 = scalar_lea.vmem %s894_s9, 32  ;;  %p1445_p11 = scmp.lt.s32.totalorder %s894_s9, %s894_s9 }
 0x472   : > { %p1439_p0 = scmp.ne.s32.totalorder %s894_s9, %s1438_s11  ;;  %p1446_p7 = scmp.lt.s32.totalorder %s1438_s11, %s1438_s11 }
 0x474   : > { %p1440_p9 = pnand %p1439_p0, %p1925_p5  ;;  %p1447_p10 = por %p1446_p7, %p1445_p11 }
 0x476   : > { %p1441_p12 = pneg %p1440_p9 }
 0x478   : > { %p1448_p13 = pnand %p1447_p10, %p1441_p12 }
 0x47a   : > { %1451 = shalt.err (!%p1448_p13)
}
 0x47b   : > { %s1452_s10 = scalar_lea.hbm %s1904_s5, 32 }
 0x47c   : > { %p1453_p2 = scmp.ne.s32.totalorder %s1904_s5, %s1452_s10  ;;  %p1458_p4 = scmp.lt.u32.totalorder %s1452_s10, %s1904_s5 }
 0x47e   : > { %p1454_p3 = pnand %p1453_p2, %p1925_p5 }
 0x480   : > { %p1455_p1 = pneg %p1454_p3 }
 0x482   : > { %p1460_p6 = pnand %p1458_p4, %p1455_p1 }
 0x484   : > { %1463 = shalt.err (!%p1460_p6)
}
 0x485   : > { %1199 = dma.vmem_to_hbm [thread:$0]  (%p1925_p5), %s894_s9, 32, %s1904_s5, [#allocation13]  }
 0x486   : > { %1501 = dma.done.wait (%p1925_p5), [#allocation13], 32  }
 0x487   : > { %1503 = vsyncadd (%p1925_p5), [#allocation13], 4294967264 }
 0x488 PF: > { %p1230_p8 = scmp.ge.s32.totalorder %s1530_s23, 2  ;;  %s909_s1 = sand.u32 1, %s1510_s18  }
 0x489   : > { %p1926_p0 = scmp.ne.s32.totalorder %s1914_s29, 0  ;;  %s910_s8 = scalar_lea.sflag [#allocation5], %s909_s1 }
 0x48b   : > { %p1218_p9 = pnand %p1230_p8, %p1926_p0 }
 0x48d   : > { %1505 = dma.done.wait (!%p1218_p9), %s910_s8, 32  }
 0x48e   : > { %1507 = vsyncadd (!%p1218_p9), %s910_s8, 4294967264  ;;  %s25_s23 = sadd.s32 1, %s1530_s23   ;;  %s1927_s18 = smov %s1514_s19 }
 0x48f   : > { %p22_p12 = scmp.ge.s32.totalorder %s25_s23, 10   ;;  %s1928_s19 = smov %s1518_s20 }
 0x490   : > { %s1929_s20 = smov %s1730_s25  ;;  %s1930_s21 = smov %s1526_s22 }
 0x491   : > { %s1931_s22 = smov %s1933_s24  ;;  %24 = sbr.rel (!%p22_p12) target bundleno = 11 (0xb), region = 111 }
 0x498   :  { %915 = vsyncpa [#allocation4], 1 }
 0x499   :  { %917 = vsyncpa [#allocation4 + $0x1], 1 }
 0x49a   :  { %918 = vsyncpa [#allocation7], 1 }
 0x49b   :  { %919 = vsyncpa [#allocation10], 1 }
 0x49c   :  { %920 = vsyncpa [#allocation5], 1 }
 0x49d   :  { %922 = vsyncpa [#allocation5 + $0x1], 1 }
 0x49e   :  { %923 = vsyncpa [#allocation13], 1 }

// kernel: gru_gcc_forward.2
= control target key start
LH: loop header
LB: loop body
LE: loop exit
PB: predicated region body
PF: predicated region fallthrough
CT: control target
= control target key end

     0   :  { %12 = vsyncpa [#allocation3], 0  ;;  %s2686_s0 = inlined_call_operand.hbm [shape: f32[16,32], index: 0, kind: input, shape index: {}]   ;;  %s2687_s1 = inlined_call_operand.hbm [shape: f32[16,24], index: 1, kind: input, shape index: {}]   ;;  %s2688_s2 = inlined_call_operand.hbm [shape: f32[16,16], index: 2, kind: input, shape index: {}]   ;;  %s2689_s3 = inlined_call_operand.hbm [shape: f32[32,96], index: 3, kind: input, shape index: {}]   ;;  %s2690_s4 = inlined_call_operand.hbm [shape: f32[24,96], index: 4, kind: input, shape index: {}]   ;;  %s2691_s5 = inlined_call_operand.hbm [shape: f32[16,96], index: 5, kind: input, shape index: {}]   ;;  %s2692_s6 = inlined_call_operand.hbm [shape: f32[1,96], index: 6, kind: input, shape index: {}]   ;;  %s2693_s7 = inlined_call_operand.hbm [shape: f32[16,96], index: 7, kind: output, shape index: {}]  }
   0x1   :  { %13 = vsyncpa [#allocation6], 0 }
   0x2   :  { %14 = vsyncpa [#allocation9], 0 }
   0x3   :  { %15 = vsyncpa [#allocation12], 0 }
   0x4   :  { %16 = vsyncpa [#allocation4], 0  ;;  %s2314_s24 = smov [#allocation5]   ;;  %s2315_s26 = smov [#allocation8]  }
   0x5   :  { %s34_s25 = sshll.u32 %s2314_s24, 4  ;;  %s58_s27 = sshll.u32 %s2315_s26, 4  ;;  %s35_s25 = int_to_ptr.vmem [resolvable:$true] %s34_s25  ;;  %s2364_s27 = int_to_ptr.vmem [resolvable:$true] %s58_s27 }
   0x6   :  { %s2128_s30 = scalar_lea.hbm %s2687_s1, 256 }
   0x7   :  { %p2129_p0 = scmp.ne.s32.totalorder %s2687_s1, %s2128_s30  ;;  %p2132_p1 = scmp.lt.u32.totalorder %s2128_s30, %s2687_s1 }
   0x9   :  { %p2134_p2 = pnand %p2132_p1, %p2129_p0 }
   0xb   :  { %2137 = shalt.err (!%p2134_p2)
}
   0xc   :  { %s2138_s12 = scalar_lea.vmem %s35_s25, 256  ;;  %p2143_p4 = scmp.lt.s32.totalorder %s35_s25, %s35_s25 }
   0xd   :  { %p2139_p3 = scmp.ne.s32.totalorder %s35_s25, %s2138_s12  ;;  %p2144_p5 = scmp.lt.s32.totalorder %s2138_s12, %s2138_s12 }
   0xf   :  { %p2145_p6 = por %p2144_p5, %p2143_p4 }
  0x11   :  { %p2146_p7 = pnand %p2145_p6, %p2139_p3 }
  0x13   :  { %2149 = shalt.err (!%p2146_p7)
}
  0x14   :  { %s2316_s13 = smov 128   ;;  %s2317_s14 = smov 8  }
  0x15   :  { %40 = dma.hbm_to_vmem [thread:$0]  %s2687_s1, 256, %s35_s25, [#allocation6], %s2316_s13, %s2316_s13, %s2317_s14  }
  0x16   :  { %s2150_s19 = scalar_lea.hbm %s2689_s3, 512 }
  0x17   :  { %p2151_p8 = scmp.ne.s32.totalorder %s2689_s3, %s2150_s19  ;;  %p2154_p9 = scmp.lt.u32.totalorder %s2150_s19, %s2689_s3 }
  0x19   :  { %p2156_p10 = pnand %p2154_p9, %p2151_p8 }
  0x1b   :  { %2159 = shalt.err (!%p2156_p10)
}
  0x1c   :  { %s2160_s24 = scalar_lea.vmem %s2364_s27, 512  ;;  %p2165_p12 = scmp.lt.s32.totalorder %s2364_s27, %s2364_s27 }
  0x1d   :  { %p2161_p11 = scmp.ne.s32.totalorder %s2364_s27, %s2160_s24  ;;  %p2166_p13 = scmp.lt.s32.totalorder %s2160_s24, %s2160_s24 }
  0x1f   :  { %p2167_p0 = por %p2166_p13, %p2165_p12 }
  0x21   :  { %p2168_p1 = pnand %p2167_p0, %p2161_p11 }
  0x23   :  { %2171 = shalt.err (!%p2168_p1)
}
  0x24   :  { %64 = dma.hbm_to_vmem [thread:$0]  %s2689_s3, 512, %s2364_s27, [#allocation9], %s2316_s13, %s2316_s13, %s2317_s14  }
  0x25   :  { %s2318_s26 = smov [#allocation11]   ;;  %s2319_s29 = smov [#allocation2]  }
  0x26   :  { %s82_s28 = sshll.u32 %s2318_s26, 4  ;;  %s22_s30 = sshll.u32 %s2319_s29, 4  ;;  %s83_s28 = int_to_ptr.vmem [resolvable:$true] %s82_s28  ;;  %s2401_s30 = int_to_ptr.vmem [resolvable:$true] %s22_s30 }
  0x27   :  { %s2172_s10 = scalar_lea.hbm %s2691_s5, 256 }
  0x28   :  { %p2173_p2 = scmp.ne.s32.totalorder %s2691_s5, %s2172_s10  ;;  %p2176_p3 = scmp.lt.u32.totalorder %s2172_s10, %s2691_s5 }
  0x2a   :  { %p2178_p4 = pnand %p2176_p3, %p2173_p2 }
  0x2c   :  { %2181 = shalt.err (!%p2178_p4)
}
  0x2d   :  { %s2182_s3 = scalar_lea.vmem %s83_s28, 256  ;;  %p2187_p6 = scmp.lt.s32.totalorder %s83_s28, %s83_s28 }
  0x2e   :  { %p2183_p5 = scmp.ne.s32.totalorder %s83_s28, %s2182_s3  ;;  %p2188_p7 = scmp.lt.s32.totalorder %s2182_s3, %s2182_s3 }
  0x30   :  { %p2189_p8 = por %p2188_p7, %p2187_p6 }
  0x32   :  { %p2190_p9 = pnand %p2189_p8, %p2183_p5 }
  0x34   :  { %2193 = shalt.err (!%p2190_p9)
}
  0x35   :  { %88 = dma.hbm_to_vmem [thread:$0]  %s2691_s5, 256, %s83_s28, [#allocation12], %s2316_s13, %s2316_s13, %s2317_s14  }
  0x36   :  { %s2194_s20 = scalar_lea.hbm %s2686_s0, 256 }
  0x37   :  { %p2195_p10 = scmp.ne.s32.totalorder %s2686_s0, %s2194_s20  ;;  %p2198_p11 = scmp.lt.u32.totalorder %s2194_s20, %s2686_s0 }
  0x39   :  { %p2200_p12 = pnand %p2198_p11, %p2195_p10 }
  0x3b   :  { %2203 = shalt.err (!%p2200_p12)
}
  0x3c   :  { %s2204_s1 = scalar_lea.vmem %s2401_s30, 256  ;;  %p2209_p0 = scmp.lt.s32.totalorder %s2401_s30, %s2401_s30 }
  0x3d   :  { %p2205_p13 = scmp.ne.s32.totalorder %s2401_s30, %s2204_s1  ;;  %p2210_p1 = scmp.lt.s32.totalorder %s2204_s1, %s2204_s1 }
  0x3f   :  { %p2211_p2 = por %p2210_p1, %p2209_p0 }
  0x41   :  { %p2212_p3 = pnand %p2211_p2, %p2205_p13 }
  0x43   :  { %2215 = shalt.err (!%p2212_p3)
}
  0x44   :  { %28 = dma.hbm_to_vmem [thread:$0]  %s2686_s0, 256, %s2401_s30, [#allocation3], %s2316_s13, %s2316_s13, %s2317_s14  }
  0x45   :  { %s2320_s26 = smov [#allocation7]   ;;  %s2321_s29 = smov [#allocation10]  }
  0x46   :  { %s46_s28 = sshll.u32 %s2320_s26, 4  ;;  %s70_s8 = sshll.u32 %s2321_s29, 4  ;;  %s47_s28 = int_to_ptr.vmem [resolvable:$true] %s46_s28  ;;  %s2438_s8 = int_to_ptr.vmem [resolvable:$true] %s70_s8 }
  0x47   :  { %s2216_s11 = scalar_lea.hbm %s2688_s2, 256 }
  0x48   :  { %p2217_p4 = scmp.ne.s32.totalorder %s2688_s2, %s2216_s11  ;;  %p2220_p5 = scmp.lt.u32.totalorder %s2216_s11, %s2688_s2 }
  0x4a   :  { %p2222_p6 = pnand %p2220_p5, %p2217_p4 }
  0x4c   :  { %2225 = shalt.err (!%p2222_p6)
}
  0x4d   :  { %s2226_s0 = scalar_lea.vmem %s47_s28, 256  ;;  %p2231_p8 = scmp.lt.s32.totalorder %s47_s28, %s47_s28 }
  0x4e   :  { %p2227_p7 = scmp.ne.s32.totalorder %s47_s28, %s2226_s0  ;;  %p2232_p9 = scmp.lt.s32.totalorder %s2226_s0, %s2226_s0 }
  0x50   :  { %p2233_p10 = por %p2232_p9, %p2231_p8 }
  0x52   :  { %p2234_p11 = pnand %p2233_p10, %p2227_p7 }
  0x54   :  { %2237 = shalt.err (!%p2234_p11)
}
  0x55   :  { %52 = dma.hbm_to_vmem [thread:$0]  %s2688_s2, 256, %s47_s28, [#allocation6], %s2316_s13, %s2316_s13, %s2317_s14  }
  0x56   :  { %s2238_s19 = scalar_lea.hbm %s2690_s4, 384 }
  0x57   :  { %p2239_p12 = scmp.ne.s32.totalorder %s2690_s4, %s2238_s19  ;;  %p2242_p13 = scmp.lt.u32.totalorder %s2238_s19, %s2690_s4 }
  0x59   :  { %p2244_p0 = pnand %p2242_p13, %p2239_p12 }
  0x5b   :  { %2247 = shalt.err (!%p2244_p0)
}
  0x5c   :  { %s2248_s24 = scalar_lea.vmem %s2438_s8, 384  ;;  %p2253_p2 = scmp.lt.s32.totalorder %s2438_s8, %s2438_s8 }
  0x5d   :  { %p2249_p1 = scmp.ne.s32.totalorder %s2438_s8, %s2248_s24  ;;  %p2254_p3 = scmp.lt.s32.totalorder %s2248_s24, %s2248_s24 }
  0x5f   :  { %p2255_p4 = por %p2254_p3, %p2253_p2 }
  0x61   :  { %p2256_p5 = pnand %p2255_p4, %p2249_p1 }
  0x63   :  { %2259 = shalt.err (!%p2256_p5)
}
  0x64   :  { %76 = dma.hbm_to_vmem [thread:$0]  %s2690_s4, 384, %s2438_s8, [#allocation9], %s2316_s13, %s2316_s13, %s2317_s14  }
  0x65   :  { %s2322_s5 = smov [#allocation13]   ;;  %s2260_s29 = scalar_lea.hbm %s2692_s6, 16 }
  0x66   :  { %s95_s25 = sshll.u32 %s2322_s5, 4  ;;  %p2261_p6 = scmp.ne.s32.totalorder %s2692_s6, %s2260_s29  ;;  %s96_s25 = int_to_ptr.vmem [resolvable:$true] %s95_s25 }
  0x67   :  { %p2264_p7 = scmp.lt.u32.totalorder %s2260_s29, %s2692_s6 }
  0x69   :  { %p2266_p8 = pnand %p2264_p7, %p2261_p6 }
  0x6b   :  { %2269 = shalt.err (!%p2266_p8)
}
  0x6c   :  { %s2270_s15 = scalar_lea.vmem %s96_s25, 16  ;;  %s2274_s4 = scalar_lea.vmem %s96_s25, 32 }
  0x6d   :  { %p2271_p9 = scmp.ne.s32.totalorder %s96_s25, %s2270_s15  ;;  %p2275_p10 = scmp.lt.s32.totalorder %s96_s25, %s96_s25 }
  0x6e   :  { %p2276_p11 = scmp.lt.s32.totalorder %s2274_s4, %s2270_s15 }
  0x70   :  { %p2277_p12 = por %p2276_p11, %p2275_p10 }
  0x72   :  { %p2278_p13 = pnand %p2277_p12, %p2271_p9 }
  0x74   :  { %2281 = shalt.err (!%p2278_p13)
}
  0x75   :  { %98 = dma.hbm_to_vmem [thread:$0]  %s2692_s6, 16, %s96_s25, [#allocation12]  }
  0x76   :  { %2304 = dma.done.wait [#allocation3], 256  }
  0x77   :  { %2305 = vsyncadd [#allocation3], 4294967040 }
  0x78   :  { %2306 = dma.done.wait [#allocation6], 512  }
  0x79   :  { %2307 = vsyncadd [#allocation6], 4294966784 }
  0x7a   :  { %2308 = dma.done.wait [#allocation9], 896  }
  0x7b   :  { %2309 = vsyncadd [#allocation9], 4294966400 }
  0x7c   :  { %2310 = dma.done.wait [#allocation12], 272  }
  0x7d   :  { %2311 = vsyncadd [#allocation12], 4294967024  ;;  %vm131_vm0 = vcmask 195584   ;;  %v128_v0 = vld [vmem:[#allocation10] sm:$0xff]  ;;  %v129_v1 = vld [vmem:[#allocation10 + $0x8] sm:$0xff]  ;;  %vm653_vm1 = vcmask 261120  }
  0x7e   :  { %v130_v2 = vld [vmem:[#allocation10 + $0x10] sm:$0xff]  ;;  %v139_v3 = vand.u32 4294901760, %v128_v0  ;;  %v142_v4 = vand.u32 4294901760, %v129_v1  ;;  %v126_v6 = vld [vmem:[#allocation5] sm:$0xff]  ;;  %v127_v7 = vld [vmem:[#allocation5 + $0x8] sm:$0xff]  ;;  %vm1192_vm2 = vcmask 130048  }
  0x7f   :  { %v2487_v5 = vand.u32 4294901760, %v130_v2  ;;  %v122_v8 = vld [vmem:[#allocation8] sm:$0xff]  ;;  %v133_v9 = vsel %vm131_vm0, %v126_v6, 0  ;;  %v136_v10 = vsel %vm131_vm0, %v127_v7, 0  ;;  %v123_v11 = vld [vmem:[#allocation8 + $0x8] sm:$0xff]  ;;  %v124_v13 = vld [vmem:[#allocation8 + $0x10] sm:$0xff] }
  0x80   :  { %v661_v12 = vand.u32 4294901760, %v122_v8  ;;  %v125_v14 = vld [vmem:[#allocation8 + $0x18] sm:$0xff]  ;;  %v2489_v15 = vpack.c.bf16 %v142_v4, %v139_v3  ;;  %v2491_v16 = vand.u32 4294901760, %v133_v9  ;;  %v2493_v17 = vand.u32 4294901760, %v136_v10  ;;  %v120_v23 = vld [vmem:[#allocation2] sm:$0xff]  ;;  %s2323_s6 = smov [#allocation14]  }
  0x81   :  { %v664_v18 = vand.u32 4294901760, %v123_v11  ;;  %v2495_v19 = vsub.f32 %v128_v0, %v139_v3  ;;  %v2497_v20 = vsub.f32 %v129_v1, %v142_v4  ;;  %v667_v21 = vand.u32 4294901760, %v124_v13  ;;  %v121_v27 = vld [vmem:[#allocation2 + $0x8] sm:$0xff]  ;;  %s1720_s3 = sshll.u32 %s2323_s6, 4  ;;  %s1721_s3 = int_to_ptr.vmem [resolvable:$true] %s1720_s3 }
  0x82   :  { %v670_v22 = vand.u32 4294901760, %v125_v14  ;;  %1989 = vmatprep.subr.bf16.mxu1 %v2489_v15  ;;  %v2501_v24 = vsub.f32 %v133_v9, %v2491_v16  ;;  %v2504_v25 = vsub.f32 %v136_v10, %v2493_v17  ;;  %v2507_v26 = vsub.f32 %v130_v2, %v2487_v5  ;;  %1841 = vmatprep.mubr.f32.mxu0 %v2491_v16  ;;  %s2282_s0 = scalar_lea.vmem %s1721_s3, 256  ;;  %p2287_p1 = scmp.lt.s32.totalorder %s1721_s3, %s1721_s3 }
  0x83   :  { %1991 = vmatpush3.bf16.msra.mxu1 %v2489_v15  ;;  %v2510_v28 = vpack.c.bf16 %v664_v18, %v661_v12  ;;  %v229_v29 = vand.u32 4294901760, %v2495_v19  ;;  %v236_v30 = vand.u32 4294901760, %v2497_v20  ;;  %v655_v35 = vsel %vm653_vm1, %v120_v23, 0  ;;  %p2283_p0 = scmp.ne.s32.totalorder %s1721_s3, %s2282_s0  ;;  %p2288_p2 = scmp.lt.s32.totalorder %s2282_s0, %s2282_s0 }
  0x84   :  { %v2514_v31 = vpack.c.bf16 %v670_v22, %v667_v21  ;;  %1830 = vmatprep.subr.mxu1 %v2487_v5  ;;  %v208_v32 = vand.u32 4294901760, %v2501_v24  ;;  %v218_v33 = vand.u32 4294901760, %v2504_v25  ;;  %v2521_v34 = vand.u32 4294901760, %v2507_v26 }
  0x85   :  { %v230_v36 = vsub.f32 %v2495_v19, %v229_v29  ;;  %v237_v37 = vsub.f32 %v2497_v20, %v236_v30  ;;  %v658_v38 = vsel %vm653_vm1, %v121_v27, 0  ;;  %v2531_v39 = vand.u32 4294901760, %v655_v35  ;;  %p2289_p3 = por %p2288_p2, %p2287_p1 }
  0x86   :  { %v209_v40 = vsub.f32 %v2501_v24, %v208_v32  ;;  %v219_v41 = vsub.f32 %v2504_v25, %v218_v33  ;;  %v244_v42 = vsub.f32 %v2507_v26, %v2521_v34  ;;  %v2541_v43 = vand.u32 4294901760, %v658_v38 }
  0x87   :  { %1831 = vmatpush3.msra.mxu1 %v2487_v5  ;;  %v231_v44 = vand.u32 4294901760, %v230_v36  ;;  %v238_v45 = vand.u32 4294901760, %v237_v37  ;;  %v2545_v46 = vsub.f32 %v655_v35, %v2531_v39  ;;  %v2547_v47 = vsub.f32 %v122_v8, %v661_v12  ;;  %v1189_v36 = vld [vmem:[#allocation7 + $0x8] sm:$0xff]  ;;  %p2290_p4 = pnand %p2289_p3, %p2283_p0 }
  0x88   :  { %v210_v48 = vand.u32 4294901760, %v209_v40  ;;  %2013 = vmatprep.subr.bf16.mxu1 %v2510_v28  ;;  %v220_v49 = vand.u32 4294901760, %v219_v41  ;;  %v245_v50 = vand.u32 4294901760, %v244_v42  ;;  %v2551_v51 = vsub.f32 %v658_v38, %v2541_v43 }
  0x89   :  { %v1992_v52 = vpack.c.bf16 %v238_v45, %v231_v44  ;;  %v731_v53 = vand.u32 4294901760, %v2545_v46  ;;  %v752_v54 = vand.u32 4294901760, %v2547_v47  ;;  %v2555_v55 = vsub.f32 %v123_v11, %v664_v18  ;;  %v1190_v18 = vld [vmem:[#allocation11] sm:$0xff] }
  0x8a   :  { %1832 = vmatprep.mubr.f32.mxu1 %v210_v48  ;;  %v741_v56 = vand.u32 4294901760, %v2551_v51  ;;  %v2558_v57 = vsub.f32 %v124_v13, %v667_v21  ;;  %v2560_v58 = vsub.f32 %v125_v14, %v670_v22  ;;  %v1996_v1 = vpack.c.bf16 %v2497_v20, %v2495_v19  ;;  %v1191_v21 = vld [vmem:[#allocation11 + $0x8] sm:$0xff]  ;;  %v1188_v22 = vld [vmem:[#allocation7] sm:$0xff] }
  0x8b   :  { %1833 = vmatmul.mubr.f32.vlgmr.msra.gmra.mrb[0].mxu1 %v220_v49  ;;  %1993 = vmatprep.subr.bf16.mxu0 %v1992_v52  ;;  %v732_v59 = vsub.f32 %v2545_v46, %v731_v53  ;;  %v753_v60 = vsub.f32 %v2547_v47, %v752_v54  ;;  %v759_v61 = vand.u32 4294901760, %v2555_v55  ;;  %v2028_v14 = vpack.c.bf16 %v2555_v55, %v2547_v47 }
  0x8c   :  { %2015 = vmatpush3.bf16.msra.mxu1 %v2510_v28  ;;  %1995 = vmatpush3.bf16.msra.mxu0 %v1992_v52  ;;  %v742_v62 = vsub.f32 %v2551_v51, %v741_v56  ;;  %v766_v63 = vand.u32 4294901760, %v2558_v57  ;;  %v773_v0 = vand.u32 4294901760, %v2560_v58  ;;  %v2032_v23 = vpack.c.bf16 %v2560_v58, %v2558_v57 }
  0x8d   :  { %2017 = vmatprep.subr.bf16.mxu1 %v2514_v31  ;;  %1839 = vmatprep.subr.mxu0 %v245_v50  ;;  %v733_v2 = vand.u32 4294901760, %v732_v59  ;;  %v754_v3 = vand.u32 4294901760, %v753_v60  ;;  %v760_v4 = vsub.f32 %v2555_v55, %v759_v61  ;;  %v1200_v27 = vand.u32 4294901760, %v1190_v18  ;;  %v1735_v59 = vld [vmem:[#allocation13] ss:$0 sm:$0xff] }
  0x8e   :  { %v767_v6 = vsub.f32 %v2558_v57, %v766_v63  ;;  %v774_v7 = vsub.f32 %v2560_v58, %v773_v0  ;;  %v743_v8 = vand.u32 4294901760, %v742_v62  ;;  %v1203_v35 = vand.u32 4294901760, %v1191_v21 }
  0x8f   :  { %1888 = vmatprep.mubr.f32.mxu1 %v733_v2  ;;  %v761_v9 = vand.u32 4294901760, %v760_v4  ;;  %v1194_v37 = vsel %vm1192_vm2, %v1188_v22, 0  ;;  %v2614_v19 = vsub.f32 %v1190_v18, %v1200_v27  ;;  %v2048_v45 = vpack.c.bf16 %v773_v0, %v766_v63 }
  0x90   :  { %2019 = vmatpush3.bf16.msra.mxu1 %v2514_v31  ;;  %1840 = vmatpush3.msra.mxu0 %v245_v50  ;;  %v768_v10 = vand.u32 4294901760, %v767_v6  ;;  %v775_v11 = vand.u32 4294901760, %v774_v7  ;;  %v2616_v20 = vsub.f32 %v1191_v21, %v1203_v35  ;;  %v2060_v47 = vpack.c.bf16 %v1203_v35, %v1200_v27 }
  0x91   :  { %1842 = vmatmul.mubr.f32.vlgmr.msra.gmra.mrb[0].mxu0 %v2493_v17  ;;  %1997 = vmatprep.subr.bf16.mxu0 %v1996_v1  ;;  %v2020_v12 = vpack.c.bf16 %v761_v9, %v754_v3  ;;  %v1289_v38 = vand.u32 4294901760, %v2614_v19  ;;  %vm1712_vm3 = vcmask 785408  }
  0x92   :  { %1999 = vmatpush3.bf16.msra.mxu0 %v1996_v1  ;;  %v2024_v13 = vpack.c.bf16 %v775_v11, %v768_v10  ;;  %1850 = vmatprep.mubr.f32.mxu0 %v2501_v24  ;;  %v1197_v24 = vsel %vm1192_vm2, %v1189_v36, 0  ;;  %v1296_v40 = vand.u32 4294901760, %v2616_v20 }
  0x93   :  { %1889 = vmatmul.mubr.f32.vlgmr.msra.gmra.mrb[2].mxu1 %v743_v8  ;;  %2021 = vmatprep.subr.bf16.mxu1 %v2020_v12  ;;  %v1290_v42 = vsub.f32 %v2614_v19, %v1289_v38 }
  0x94   :  { %2023 = vmatpush3.bf16.msra.mxu1 %v2020_v12  ;;  %1848 = vmatprep.subr.mxu0 %v2507_v26  ;;  %v1297_v44 = vsub.f32 %v2616_v20, %v1296_v40 }
  0x95   :  { %2025 = vmatprep.subr.bf16.mxu1 %v2024_v13  ;;  %1899 = vmatprep.mubr.f32.mxu1 %v2531_v39  ;;  %v1291_v48 = vand.u32 4294901760, %v1290_v42 }
  0x96   :  { %1849 = vmatpush3.msra.mxu0 %v2507_v26  ;;  %v2004_v26 = vpack.c.bf16 %v236_v30, %v229_v29  ;;  %v2621_v29 = vand.u32 4294901760, %v1197_v24  ;;  %v1298_v49 = vand.u32 4294901760, %v1297_v44 }
  0x97   :  { %2001 = vmatprep.subr.bf16.mxu0 %v2489_v15 }
  0x98   :  { %2027 = vmatpush3.bf16.msra.mxu1 %v2024_v13 }
  0x99   :  { %1851 = vmatmul.mubr.f32.vlgmr.msra.gmra.mrb[0].mxu0 %v2504_v25  ;;  %2029 = vmatprep.subr.bf16.mxu1 %v2028_v14  ;;  %v2044_v25 = vpack.c.bf16 %v759_v61, %v752_v54 }
  0x9a   :  { %2003 = vmatpush3.bf16.msra.mxu0 %v2489_v15  ;;  %1859 = vmatprep.mubr.f32.mxu0 %v208_v32  ;;  %v2612_v32 = vand.u32 4294901760, %v1194_v37 }
  0x9b   :  { %1900 = vmatmul.mubr.f32.vlgmr.msra.gmra.mrb[2].mxu1 %v2541_v43  ;;  %1857 = vmatprep.subr.mxu0 %v2487_v5 }
  0x9c   :  { %2031 = vmatpush3.bf16.msra.mxu1 %v2028_v14  ;;  %1910 = vmatprep.mubr.f32.mxu1 %v2545_v46  ;;  %v1267_v30 = vsub.f32 %v1194_v37, %v2612_v32 }
  0x9d   :  { %2033 = vmatprep.subr.bf16.mxu1 %v2032_v23 }
  0x9e   :  { %1858 = vmatpush3.msra.mxu0 %v2487_v5  ;;  %v1268_v41 = vand.u32 4294901760, %v1267_v30 }
  0x9f   :  { %2005 = vmatprep.subr.bf16.mxu0 %v2004_v26 }
  0xa0   :  { %2035 = vmatpush3.bf16.msra.mxu1 %v2032_v23 }
  0xa1   :  { %1860 = vmatmul.mubr.f32.vlgmr.msra.gmra.mrb[0].mxu0 %v218_v33  ;;  %2037 = vmatprep.subr.bf16.mxu1 %v2510_v28  ;;  %v1277_v33 = vsub.f32 %v1197_v24, %v2621_v29 }
  0xa2   :  { %2007 = vmatpush3.bf16.msra.mxu0 %v2004_v26  ;;  %1868 = vmatprep.mubr.f32.mxu0 %v2491_v16 }
  0xa3   :  { %1911 = vmatmul.mubr.f32.vlgmr.msra.gmra.mrb[2].mxu1 %v2551_v51  ;;  %1866 = vmatprep.subr.mxu0 %v2521_v34  ;;  %v1278_v46 = vand.u32 4294901760, %v1277_v33  ;;  %v2068_v51 = vpack.c.bf16 %v2616_v20, %v2614_v19 }
  0xa4   :  { %2039 = vmatpush3.bf16.msra.mxu1 %v2510_v28  ;;  %1921 = vmatprep.mubr.f32.mxu1 %v731_v53 }
  0xa5   :  { %2041 = vmatprep.subr.bf16.mxu1 %v2514_v31  ;;  %v1279_v50 = vsub.f32 %v1277_v33, %v1278_v46 }
  0xa6   :  { %1867 = vmatpush3.msra.mxu0 %v2521_v34  ;;  %v1269_v34 = vsub.f32 %v1267_v30, %v1268_v41 }
  0xa7   :  { %2009 = vmatprep.subr.bf16.mxu0 %v2489_v15 }
  0xa8   :  { %2043 = vmatpush3.bf16.msra.mxu1 %v2514_v31  ;;  %v1270_v52 = vand.u32 4294901760, %v1269_v34 }
  0xa9   :  { %1869 = vmatmul.mubr.f32.vlgmr.msra.gmra.mrb[0].mxu0 %v2493_v17  ;;  %2045 = vmatprep.subr.bf16.mxu1 %v2044_v25 }
  0xaa   :  { %2011 = vmatpush3.bf16.msra.mxu0 %v2489_v15  ;;  %1877 = vmatprep.mubr.f32.mxu0 %v2491_v16  ;;  %v2064_v15 = vpack.c.bf16 %v1298_v49, %v1291_v48  ;;  %v1280_v16 = vand.u32 4294901760, %v1279_v50 }
  0xab   :  { %1922 = vmatmul.mubr.f32.vlgmr.msra.gmra.mrb[2].mxu1 %v741_v56  ;;  %1875 = vmatprep.subr.mxu0 %v2487_v5 }
  0xac   :  { %2047 = vmatpush3.bf16.msra.mxu1 %v2044_v25  ;;  %1932 = vmatprep.mubr.f32.mxu1 %v2531_v39 }
  0xad   :  { %2049 = vmatprep.subr.bf16.mxu1 %v2048_v45 }
  0xae   :  { %1876 = vmatpush3.msra.mxu0 %v2487_v5  ;;  %v2076_v5 = vpack.c.bf16 %v1296_v40, %v1289_v38 }
  0xaf   :  { %2061 = vmatprep.subr.bf16.mxu0 %v2060_v47 }
  0xb0   :  { %2051 = vmatpush3.bf16.msra.mxu1 %v2048_v45 }
  0xb1   :  { %1878 = vmatmul.mubr.f32.vlgmr.msra.gmra.mrb[0].mxu0 %v2493_v17  ;;  %2053 = vmatprep.subr.bf16.mxu1 %v2510_v28 }
  0xb2   :  { %2063 = vmatpush3.bf16.msra.mxu0 %v2060_v47  ;;  %1950 = vmatprep.mubr.f32.mxu0 %v1270_v52 }
  0xb3   :  { %1933 = vmatmul.mubr.f32.vlgmr.msra.gmra.mrb[2].mxu1 %v2541_v43  ;;  %2065 = vmatprep.subr.bf16.mxu0 %v2064_v15 }
  0xb4   :  { %2055 = vmatpush3.bf16.msra.mxu1 %v2510_v28  ;;  %1943 = vmatprep.mubr.f32.mxu1 %v2531_v39 }
  0xb5   :  { %1951 = vmatmul.mubr.f32.vlgmr.msra.gmra.mrb[2].mxu0 %v1280_v16  ;;  %2057 = vmatprep.subr.bf16.mxu1 %v2514_v31 }
  0xb6   :  { %2067 = vmatpush3.bf16.msra.mxu0 %v2064_v15  ;;  %1957 = vmatprep.mubr.f32.mxu0 %v2612_v32 }
  0xb7   :  { %2069 = vmatprep.subr.bf16.mxu0 %v2068_v51 }
  0xb8   :  { %2059 = vmatpush3.bf16.msra.mxu1 %v2514_v31 }
  0xbb   :  { %1944 = vmatmul.mubr.f32.vlgmr.msra.gmra.mrb[2].mxu1 %v2541_v43 }
  0xbd   :  { %1958 = vmatmul.mubr.f32.vlgmr.msra.gmra.mrb[2].mxu0 %v2621_v29 }
  0xbe   :  { %2071 = vmatpush3.bf16.msra.mxu0 %v2068_v51  ;;  %1964 = vmatprep.mubr.f32.mxu0 %v1267_v30 }
  0xbf   :  { %2073 = vmatprep.subr.bf16.mxu0 %v2060_v47 }
  0xc5   :  { %1965 = vmatmul.mubr.f32.vlgmr.msra.gmra.mrb[2].mxu0 %v1277_v33 }
  0xc6   :  { %2075 = vmatpush3.bf16.msra.mxu0 %v2060_v47  ;;  %1971 = vmatprep.mubr.f32.mxu0 %v1268_v41 }
  0xc7   :  { %2077 = vmatprep.subr.bf16.mxu0 %v2076_v5 }
  0xcd   :  { %1972 = vmatmul.mubr.f32.vlgmr.msra.gmra.mrb[2].mxu0 %v1278_v46 }
  0xce   :  { %2079 = vmatpush3.bf16.msra.mxu0 %v2076_v5  ;;  %1978 = vmatprep.mubr.f32.mxu0 %v2612_v32 }
  0xcf   :  { %2081 = vmatprep.subr.bf16.mxu0 %v2060_v47 }
  0xd5   :  { %1979 = vmatmul.mubr.f32.vlgmr.msra.gmra.mrb[2].mxu0 %v2621_v29 }
  0xd6   :  { %2083 = vmatpush3.bf16.msra.mxu0 %v2060_v47  ;;  %1985 = vmatprep.mubr.f32.mxu0 %v2612_v32 }
  0xdd   :  { %1986 = vmatmul.mubr.f32.vlgmr.msra.gmra.mrb[2].mxu0 %v2621_v29 }
 0x15e   :  { %v1834_v17 = vpop.f32.mrb[0].mxu1 }
 0x15f   :  { %v212_v28 = vpop.f32.mrb[1].mxu1 }
 0x184   :  { %v1879_v31 = vpop.f32.mrb[0].mxu0 }
 0x185   :  { %v2084_v39 = vadd.f32 %v1879_v31, %v1834_v17  ;;  %v643_v43 = vpop.f32.mrb[1].mxu0 }
 0x186   :  { %v2087_v53 = vadd.f32 %v643_v43, %v212_v28 }
 0x18e   :  { %v1945_v54 = vpop.f32.mrb[2].mxu1 }
 0x18f   :  { %v2085_v55 = vadd.f32 %v2084_v39, %v1945_v54  ;;  %v1178_v56 = vpop.f32.mrb[3].mxu1 }
 0x190   :  { %v2088_v57 = vadd.f32 %v2087_v53, %v1178_v56 }
 0x1b0   :  { %v1987_v58 = vpop.f32.mrb[2].mxu0 }
 0x1b1   :  { %v2086_v60 = vadd.f32 %v2085_v55, %v1987_v58  ;;  %v1691_v61 = vpop.f32.mrb[3].mxu0 }
 0x1b2   :  { %v2089_v62 = vadd.f32 %v2088_v57, %v1691_v61 }
 0x1b3   :  { %v1711_v63 = vadd.f32 %v2086_v60, %v1735_v59 }
 0x1b4   :  { %v1710_v0 = vadd.f32 %v2089_v62, %v1735_v59 }
 0x1b5   :  { %1714 = vst.msk [vmem:[#allocation14 + $0x8] sm:$0xff] %vm1712_vm3, %v1711_v63 }
 0x1b6   :  { %1713 = vst.msk [vmem:[#allocation14] sm:$0xff] %vm1712_vm3, %v1710_v0 }
 0x1b7   :  { %2293 = shalt.err (!%p2290_p4)
}
 0x1b8   :  { %s2294_s17 = scalar_lea.hbm %s2693_s7, 256 }
 0x1b9   :  { %p2295_p5 = scmp.ne.s32.totalorder %s2693_s7, %s2294_s17  ;;  %p2298_p6 = scmp.lt.u32.totalorder %s2294_s17, %s2693_s7 }
 0x1bb   :  { %p2300_p7 = pnand %p2298_p6, %p2295_p5 }
 0x1bd   :  { %2303 = shalt.err (!%p2300_p7)
}
 0x1be   :  { %1726 = dma.vmem_to_hbm [thread:$0]  %s1721_s3, 256, %s2693_s7, [#allocation4], %s2316_s13, %s2316_s13, %s2317_s14  }
 0x1bf   :  { %2312 = dma.done.wait [#allocation4], 256  }
 0x1c0   :  { %2313 = vsyncadd [#allocation4], 4294967040 }
 0x1c1   :  { %1730 = vsyncpa [#allocation3], 1 }
 0x1c2   :  { %1731 = vsyncpa [#allocation6], 1 }
 0x1c3   :  { %1732 = vsyncpa [#allocation9], 1 }
 0x1c4   :  { %1733 = vsyncpa [#allocation12], 1 }
 0x1c5   :  { %1734 = vsyncpa [#allocation4], 1 }

</bundles_post_ra>
